<compile_context>
chip_gen: v7x
topology: tpu7x:2x2x1
jax: 0.10.0
libtpu: 0.0.40
codegen_flags: <defaults>
</compile_context>

<pallas_src>
import math

import jax
import jax.numpy as jnp
from jax.experimental import pallas as pl
from jax.experimental.pallas import tpu as pltpu

# ---- small synthetic shapes standing in for bert-base (768 -> 32, etc.) ----
N = 2              # batch (number of text sequences)
S = 8              # padded sequence length
H = 32             # hidden / embedding_dim
NUM_HEADS = 4
HEAD_DIM = H // NUM_HEADS
FFN = 4 * H        # 128
VOCAB = 100        # logical vocabulary
VOCAB_PAD = 128    # padded to a full lane tile for the one-hot gather matmul
NUM_LAYERS = 2
LN_EPS = 1e-12     # BERT default layer-norm eps
NEG_INF = -1e9

# Generous ceiling over the real footprint (~20 KB constants + 2x ~26 KB of
# double-buffered per-layer weights + tiny activations, plus (8,128) tile
# padding of the many small operands). Fails loudly instead of silently
# spilling if shapes ever grow.
VMEM_LIMIT_BYTES = 4 * 1024 * 1024


def _layer_norm(x, gamma, beta):
    # f32 statistics (eps = 1e-12 underflows bf16)
    mean = jnp.mean(x, axis=-1, keepdims=True)
    var = jnp.mean((x - mean) ** 2, axis=-1, keepdims=True)
    inv = jax.lax.rsqrt(var + LN_EPS)
    return (x - mean) * inv * gamma + beta


# ------------------------- fused Pallas kernel (one grid step = one layer) ---
def bert_kernel(ids_ref, mask_ref, tok_tab_ref, pos_seg_ref,
                emb_g_ref, emb_b_ref,
                wqkv_ref, bqkv_ref, wo_ref, bo_ref, ln1_g_ref, ln1_b_ref,
                w1_ref, b1_ref, w2_ref, b2_ref, ln2_g_ref, ln2_b_ref,
                hidden_ref, x_sc):
    layer = pl.program_id(0)

    # ---- embedding lookup + embedding LayerNorm (first grid step only) -----
    @pl.when(layer == 0)
    def _embed():
        ids = ids_ref[...]                                          # (N*S, 1) i32
        vocab_iota = jax.lax.broadcasted_iota(jnp.int32, (N * S, VOCAB_PAD), 1)
        one_hot = (ids == vocab_iota).astype(jnp.bfloat16)          # bf16 one-hot
        # TODO(synk): ids >= VOCAB silently map to a zero embedding (padded
        # rows of tok_table); acceptable for the synthetic driver.
        tok = jnp.dot(one_hot, tok_tab_ref[...],
                      preferred_element_type=jnp.float32)           # (N*S, H)
        x_sc[...] = _layer_norm(tok + pos_seg_ref[...],             # + pos + seg0
                                emb_g_ref[...], emb_b_ref[...])

    x = x_sc[...]                                                   # (N*S, H) f32
    xb = x.astype(jnp.bfloat16)

    # additive key-padding bias, broadcast ONCE per layer (not once per head)
    bias = jnp.broadcast_to((1.0 - mask_ref[...]) * NEG_INF, (N, S, S))

    # ---- fused QKV projection: one (N*S, H) x (H, 3H) matmul ---------------
    qkv = jnp.dot(xb, wqkv_ref[...],
                  preferred_element_type=jnp.float32) + bqkv_ref[...]
    q = qkv[:, 0 * H:1 * H]
    k = qkv[:, 1 * H:2 * H]
    v = qkv[:, 2 * H:3 * H]

    # ---- attention: heads statically unrolled, each contraction batched over
    # the sequence/batch dim (single leading batch dim = Mosaic-supported
    # batched dot). 1/sqrt(head_dim) already folded into wq / bq at init. -----
    ctx_heads = []
    for h in range(NUM_HEADS):
        sl = slice(h * HEAD_DIM, (h + 1) * HEAD_DIM)
        qh = q[:, sl].reshape(N, S, HEAD_DIM).astype(jnp.bfloat16)
        kh = k[:, sl].reshape(N, S, HEAD_DIM).astype(jnp.bfloat16)
        vh = v[:, sl].reshape(N, S, HEAD_DIM).astype(jnp.bfloat16)
        s = jnp.einsum('bqd,bkd->bqk', qh, kh,
                       preferred_element_type=jnp.float32) + bias
        s = s - jnp.max(s, axis=-1, keepdims=True)
        p = jnp.exp(s)
        p = p * pl.reciprocal(jnp.sum(p, axis=-1, keepdims=True), approx=True)
        ctx = jnp.einsum('bqk,bkd->bqd', p.astype(jnp.bfloat16), vh,
                         preferred_element_type=jnp.float32)        # (N, S, HD)
        ctx_heads.append(ctx.reshape(N * S, HEAD_DIM))

    # one lane concat + ONE output projection (no per-head dots / f32 accumulator)
    ctx_all = jnp.concatenate(ctx_heads, axis=-1).astype(jnp.bfloat16)  # (N*S, H)
    attn = jnp.dot(ctx_all, wo_ref[...],
                   preferred_element_type=jnp.float32) + bo_ref[...]

    x1 = _layer_norm(x + attn, ln1_g_ref[...], ln1_b_ref[...])

    # ---- feed-forward -------------------------------------------------------
    hid = jnp.dot(x1.astype(jnp.bfloat16), w1_ref[...],
                  preferred_element_type=jnp.float32) + b1_ref[...]
    # TODO(synk): HF BERT uses exact erf GELU; tanh approximation kept here
    # (exp/tanh are the EUP-supported transcendentals).
    hid = jax.nn.gelu(hid)
    ffn = jnp.dot(hid.astype(jnp.bfloat16), w2_ref[...],
                  preferred_element_type=jnp.float32) + b2_ref[...]
    x_new = _layer_norm(x1 + ffn, ln2_g_ref[...], ln2_b_ref[...])
    x_sc[...] = x_new                                               # carry to next layer

    # full, aligned (N*S, H) store; [CLS] slice is a free view in the wrapper
    @pl.when(layer == NUM_LAYERS - 1)
    def _store():
        hidden_ref[...] = x_new


# ------------------------- wrapper -------------------------------------------
def _per_layer_spec(*tail):
    zeros = (0,) * len(tail)
    return pl.BlockSpec((None,) + tail, lambda l: (l,) + zeros)


@jax.jit
def bert_embedding_forward(input_ids, attention_mask, params):
    # TODO(synk): BertTokenizer (string -> ids) has no Pallas equivalent; token
    # ids are supplied directly.
    ids = input_ids.reshape(N * S, 1).astype(jnp.int32)
    mask = attention_mask.reshape(N, 1, S).astype(jnp.float32)

    # constants: whole-array, VMEM-resident for the entire grid
    vmem_full = pl.BlockSpec(memory_space=pltpu.MemorySpace.VMEM)
    in_specs = [
        vmem_full,                       # ids        (N*S, 1)
        vmem_full,                       # mask       (N, 1, S)
        vmem_full,                       # tok_table  (VOCAB_PAD, H)
        vmem_full,                       # pos_seg    (N*S, H)
        vmem_full, vmem_full,            # embedding LN gamma / beta
        _per_layer_spec(H, 3 * H),       # wqkv
        _per_layer_spec(1, 3 * H),       # bqkv
        _per_layer_spec(H, H),           # wo
        _per_layer_spec(1, H),           # bo
        _per_layer_spec(1, H),           # ln1_g
        _per_layer_spec(1, H),           # ln1_b
        _per_layer_spec(H, FFN),         # w1
        _per_layer_spec(1, FFN),         # b1
        _per_layer_spec(FFN, H),         # w2
        _per_layer_spec(1, H),           # b2
        _per_layer_spec(1, H),           # ln2_g
        _per_layer_spec(1, H),           # ln2_b
    ]
    out_spec = pl.BlockSpec((N * S, H), lambda l: (0, 0))

    args = (ids, mask, params['tok_table'], params['pos_seg'],
            params['emb_ln_g'], params['emb_ln_b'],
            params['wqkv'], params['bqkv'], params['wo'], params['bo'],
            params['ln1_g'], params['ln1_b'],
            params['w1'], params['b1'], params['w2'], params['b2'],
            params['ln2_g'], params['ln2_b'])

    hidden = pl.pallas_call(
        bert_kernel,
        out_shape=jax.ShapeDtypeStruct((N * S, H), jnp.float32),
        grid_spec=pltpu.PrefetchScalarGridSpec(
            num_scalar_prefetch=0,
            grid=(NUM_LAYERS,),
            in_specs=in_specs,
            out_specs=out_spec,
            scratch_shapes=[pltpu.VMEM((N * S, H), jnp.float32)]),
        compiler_params=pltpu.CompilerParams(
            dimension_semantics=("arbitrary",),     # layers are sequential
            vmem_limit_bytes=VMEM_LIMIT_BYTES),
    )(*args)

    # outputs.last_hidden_state[:, 0, :] -> [CLS] row per sequence (free view)
    return hidden.reshape(N, S, H)[:, 0, :]


# ------------------------- parameters ----------------------------------------
def init_params(key):
    def norm(k, shape, scale=0.02):
        return scale * jax.random.normal(k, shape, dtype=jnp.float32)

    ks = jax.random.split(key, 9)
    attn_scale = 1.0 / math.sqrt(HEAD_DIM)

    tok = norm(ks[0], (VOCAB, H))
    tok_padded = jnp.zeros((VOCAB_PAD, H), jnp.float32).at[:VOCAB].set(tok)
    pos = norm(ks[1], (S, H))
    seg = norm(ks[2], (2, H))

    # attention scale 1/sqrt(head_dim) folded into W_q / b_q at init time;
    # Q, K, V stacked into one (L, H, 3H) weight for a single fused matmul.
    wq = norm(ks[3], (NUM_LAYERS, H, H)) * attn_scale
    wk = norm(ks[4], (NUM_LAYERS, H, H))
    wv = norm(ks[5], (NUM_LAYERS, H, H))
    wqkv = jnp.concatenate([wq, wk, wv], axis=-1)

    return {
        'tok_table': tok_padded.astype(jnp.bfloat16),       # vocab padded to 128
        # segment id is always 0 here -> fold seg[0] into pos; pre-tile to (N*S, H)
        'pos_seg': jnp.tile(pos + seg[0][None, :], (N, 1)),
        'emb_ln_g': jnp.ones((1, H), jnp.float32),
        'emb_ln_b': jnp.zeros((1, H), jnp.float32),
        'wqkv': wqkv.astype(jnp.bfloat16),                  # (L, H, 3H)
        'bqkv': jnp.zeros((NUM_LAYERS, 1, 3 * H), jnp.float32),
        'wo': norm(ks[6], (NUM_LAYERS, H, H)).astype(jnp.bfloat16),
        'bo': jnp.zeros((NUM_LAYERS, 1, H), jnp.float32),
        'ln1_g': jnp.ones((NUM_LAYERS, 1, H), jnp.float32),
        'ln1_b': jnp.zeros((NUM_LAYERS, 1, H), jnp.float32),
        'w1': norm(ks[7], (NUM_LAYERS, H, FFN)).astype(jnp.bfloat16),
        'b1': jnp.zeros((NUM_LAYERS, 1, FFN), jnp.float32),
        'w2': norm(ks[8], (NUM_LAYERS, FFN, H)).astype(jnp.bfloat16),
        'b2': jnp.zeros((NUM_LAYERS, 1, H), jnp.float32),
        'ln2_g': jnp.ones((NUM_LAYERS, 1, H), jnp.float32),
        'ln2_b': jnp.zeros((NUM_LAYERS, 1, H), jnp.float32),
    }


if __name__ == "__main__":
    key = jax.random.PRNGKey(0)
    k_par, k_ids = jax.random.split(key)

    params = init_params(k_par)

    # synthetic "tokenizer output" for N text sequences, padded to length S
    input_ids = jax.random.randint(k_ids, (N, S), 0, VOCAB, dtype=jnp.int32)
    input_ids = input_ids.at[:, 0].set(1)                   # [CLS] token id
    attention_mask = jnp.array([[1] * S,
                                [1] * (S - 2) + [0, 0]], dtype=jnp.int32)

    out = bert_embedding_forward(input_ids, attention_mask, params)
    out = jax.block_until_ready(out)
    assert out.shape == (N, H) and out.dtype == jnp.float32
    print("KERNEL_OK")
</pallas_src>

<mosaic_0001>
module attributes {stable_mosaic.version = 11 : i64} {
  func.func @bert_kernel(%arg0: i32, %arg1: memref<16x1xi32, #tpu.memory_space<vmem>>, %arg2: memref<2x1x8xf32, #tpu.memory_space<vmem>>, %arg3: memref<128x32xbf16, #tpu.memory_space<vmem>>, %arg4: memref<16x32xf32, #tpu.memory_space<vmem>>, %arg5: memref<1x32xf32, #tpu.memory_space<vmem>>, %arg6: memref<1x32xf32, #tpu.memory_space<vmem>>, %arg7: memref<1x32x96xbf16, #tpu.memory_space<vmem>>, %arg8: memref<1x1x96xf32, #tpu.memory_space<vmem>>, %arg9: memref<1x32x32xbf16, #tpu.memory_space<vmem>>, %arg10: memref<1x1x32xf32, #tpu.memory_space<vmem>>, %arg11: memref<1x1x32xf32, #tpu.memory_space<vmem>>, %arg12: memref<1x1x32xf32, #tpu.memory_space<vmem>>, %arg13: memref<1x32x128xbf16, #tpu.memory_space<vmem>>, %arg14: memref<1x1x128xf32, #tpu.memory_space<vmem>>, %arg15: memref<1x128x32xbf16, #tpu.memory_space<vmem>>, %arg16: memref<1x1x32xf32, #tpu.memory_space<vmem>>, %arg17: memref<1x1x32xf32, #tpu.memory_space<vmem>>, %arg18: memref<1x1x32xf32, #tpu.memory_space<vmem>>, %arg19: memref<16x32xf32, #tpu.memory_space<vmem>>, %arg20: memref<16x32xf32, #tpu.memory_space<vmem>>) attributes {dimension_semantics = [#tpu.dimension_semantics<arbitrary>], iteration_bounds = array<i64: 2>, scalar_prefetch = 0 : i64, scratch_operands = 1 : i64, tpu.core_type = #tpu.core_type<tc>, window_params = [{pipeline_mode = #tpu.pipeline_mode<synchronous>, transform_indices = @transform_0, window_bounds = array<i64: 16, 1>}, {pipeline_mode = #tpu.pipeline_mode<synchronous>, transform_indices = @transform_1, window_bounds = array<i64: 2, 1, 8>}, {pipeline_mode = #tpu.pipeline_mode<synchronous>, transform_indices = @transform_2, window_bounds = array<i64: 128, 32>}, {pipeline_mode = #tpu.pipeline_mode<synchronous>, transform_indices = @transform_3, window_bounds = array<i64: 16, 32>}, {pipeline_mode = #tpu.pipeline_mode<synchronous>, transform_indices = @transform_4, window_bounds = array<i64: 1, 32>}, {pipeline_mode = #tpu.pipeline_mode<synchronous>, transform_indices = @transform_5, window_bounds = array<i64: 1, 32>}, {transform_indices = @transform_6, window_bounds = array<i64: 1, 32, 96>}, {transform_indices = @transform_7, window_bounds = array<i64: 1, 1, 96>}, {transform_indices = @transform_8, window_bounds = array<i64: 1, 32, 32>}, {transform_indices = @transform_9, window_bounds = array<i64: 1, 1, 32>}, {transform_indices = @transform_10, window_bounds = array<i64: 1, 1, 32>}, {transform_indices = @transform_11, window_bounds = array<i64: 1, 1, 32>}, {transform_indices = @transform_12, window_bounds = array<i64: 1, 32, 128>}, {transform_indices = @transform_13, window_bounds = array<i64: 1, 1, 128>}, {transform_indices = @transform_14, window_bounds = array<i64: 1, 128, 32>}, {transform_indices = @transform_15, window_bounds = array<i64: 1, 1, 32>}, {transform_indices = @transform_16, window_bounds = array<i64: 1, 1, 32>}, {transform_indices = @transform_17, window_bounds = array<i64: 1, 1, 32>}, {pipeline_mode = #tpu.pipeline_mode<synchronous>, transform_indices = @transform_18, window_bounds = array<i64: 16, 32>}]} {
    %c0_i32 = arith.constant 0 : i32
    %0 = arith.cmpi eq, %arg0, %c0_i32 : i32
    %1 = arith.extui %0 : i1 to i32
    %c0_i32_0 = arith.constant 0 : i32
    %2 = arith.cmpi ne, %1, %c0_i32_0 : i32
    scf.if %2 {
      %c0_79 = arith.constant 0 : index
      %c0_80 = arith.constant 0 : index
      %214 = vector.load %arg1[%c0_79, %c0_80] : memref<16x1xi32, #tpu.memory_space<vmem>>, vector<16x1xi32>
      %215 = tpu.iota {dimensions = array<i32: 1>} : vector<16x128xi32>
      %216 = vector.broadcast %214 : vector<16x1xi32> to vector<16x128xi32>
      %217 = arith.cmpi eq, %216, %215 : vector<16x128xi32>
      %218 = arith.extui %217 : vector<16x128xi1> to vector<16x128xi32>
      %219 = arith.sitofp %218 : vector<16x128xi32> to vector<16x128xf32>
      %220 = arith.truncf %219 : vector<16x128xf32> to vector<16x128xbf16>
      %c0_81 = arith.constant 0 : index
      %c0_82 = arith.constant 0 : index
      %221 = vector.load %arg3[%c0_81, %c0_82] : memref<128x32xbf16, #tpu.memory_space<vmem>>, vector<128x32xbf16>
      %cst_83 = arith.constant dense<0.000000e+00> : vector<16x32xf32>
      %222 = tpu.matmul %220, %221, %cst_83 {dimension_numbers = #tpu.dot_dimension_numbers<[1], [0], [0], [1], [0, 0, 1, 1], [], []>} : vector<16x128xbf16>, vector<128x32xbf16>, vector<16x32xf32> -> vector<16x32xf32>
      %c0_84 = arith.constant 0 : index
      %c0_85 = arith.constant 0 : index
      %223 = vector.load %arg4[%c0_84, %c0_85] : memref<16x32xf32, #tpu.memory_space<vmem>>, vector<16x32xf32>
      %224 = arith.addf %222, %223 : vector<16x32xf32>
      %c0_86 = arith.constant 0 : index
      %c0_87 = arith.constant 0 : index
      %225 = vector.load %arg5[%c0_86, %c0_87] : memref<1x32xf32, #tpu.memory_space<vmem>>, vector<1x32xf32>
      %c0_88 = arith.constant 0 : index
      %c0_89 = arith.constant 0 : index
      %226 = vector.load %arg6[%c0_88, %c0_89] : memref<1x32xf32, #tpu.memory_space<vmem>>, vector<1x32xf32>
      %cst_90 = arith.constant dense<0.000000e+00> : vector<16xf32>
      %227 = vector.multi_reduction <add>, %224, %cst_90 [1] : vector<16x32xf32> to vector<16xf32>
      %228 = vector.shape_cast %227 : vector<16xf32> to vector<16x1xf32>
      %cst_91 = arith.constant 3.200000e+01 : f32
      %229 = vector.broadcast %cst_91 : f32 to vector<16x1xf32>
      %230 = arith.divf %228, %229 : vector<16x1xf32>
      %231 = vector.broadcast %230 : vector<16x1xf32> to vector<16x32xf32>
      %232 = arith.subf %224, %231 : vector<16x32xf32>
      %233 = arith.mulf %232, %232 : vector<16x32xf32>
      %cst_92 = arith.constant dense<0.000000e+00> : vector<16xf32>
      %234 = vector.multi_reduction <add>, %233, %cst_92 [1] : vector<16x32xf32> to vector<16xf32>
      %235 = vector.shape_cast %234 : vector<16xf32> to vector<16x1xf32>
      %cst_93 = arith.constant 3.200000e+01 : f32
      %236 = vector.broadcast %cst_93 : f32 to vector<16x1xf32>
      %237 = arith.divf %235, %236 : vector<16x1xf32>
      %cst_94 = arith.constant 9.99999996E-13 : f32
      %238 = vector.broadcast %cst_94 : f32 to vector<16x1xf32>
      %239 = arith.addf %237, %238 : vector<16x1xf32>
      %240 = math.rsqrt %239 : vector<16x1xf32>
      %241 = vector.broadcast %230 : vector<16x1xf32> to vector<16x32xf32>
      %242 = arith.subf %224, %241 : vector<16x32xf32>
      %243 = vector.broadcast %240 : vector<16x1xf32> to vector<16x32xf32>
      %244 = arith.mulf %242, %243 : vector<16x32xf32>
      %245 = vector.broadcast %225 : vector<1x32xf32> to vector<16x32xf32>
      %246 = arith.mulf %244, %245 : vector<16x32xf32>
      %247 = vector.broadcast %226 : vector<1x32xf32> to vector<16x32xf32>
      %248 = arith.addf %246, %247 : vector<16x32xf32>
      %c0_95 = arith.constant 0 : index
      %c0_96 = arith.constant 0 : index
      %249 = vector.load %arg20[%c0_95, %c0_96] : memref<16x32xf32, #tpu.memory_space<vmem>>, vector<16x32xf32>
      tpu.vector_store %arg20[%c0_95, %c0_96], %248 {strides = array<i32>} : memref<16x32xf32, #tpu.memory_space<vmem>>, vector<16x32xf32>,
    } else {
    }
    %c0 = arith.constant 0 : index
    %c0_1 = arith.constant 0 : index
    %3 = vector.load %arg20[%c0, %c0_1] : memref<16x32xf32, #tpu.memory_space<vmem>>, vector<16x32xf32>
    %4 = arith.truncf %3 : vector<16x32xf32> to vector<16x32xbf16>
    %c0_2 = arith.constant 0 : index
    %c0_3 = arith.constant 0 : index
    %c0_4 = arith.constant 0 : index
    %5 = vector.load %arg2[%c0_2, %c0_3, %c0_4] : memref<2x1x8xf32, #tpu.memory_space<vmem>>, vector<2x1x8xf32>
    %cst = arith.constant 1.000000e+00 : f32
    %6 = vector.broadcast %cst : f32 to vector<2x1x8xf32>
    %7 = arith.subf %6, %5 : vector<2x1x8xf32>
    %cst_5 = arith.constant -1.000000e+09 : f32
    %8 = vector.broadcast %cst_5 : f32 to vector<2x1x8xf32>
    %9 = arith.mulf %7, %8 : vector<2x1x8xf32>
    %10 = vector.shape_cast %9 : vector<2x1x8xf32> to vector<2x1x8xf32>
    %11 = vector.broadcast %10 : vector<2x1x8xf32> to vector<2x8x8xf32>
    %c0_6 = arith.constant 0 : index
    %c0_7 = arith.constant 0 : index
    %c0_8 = arith.constant 0 : index
    %12 = vector.load %arg7[%c0_6, %c0_7, %c0_8] : memref<1x32x96xbf16, #tpu.memory_space<vmem>>, vector<1x32x96xbf16>
    %13 = vector.shape_cast %12 : vector<1x32x96xbf16> to vector<32x96xbf16>
    %cst_9 = arith.constant dense<0.000000e+00> : vector<16x96xf32>
    %14 = tpu.matmul %4, %13, %cst_9 {dimension_numbers = #tpu.dot_dimension_numbers<[1], [0], [0], [1], [0, 0, 1, 1], [], []>} : vector<16x32xbf16>, vector<32x96xbf16>, vector<16x96xf32> -> vector<16x96xf32>
    %c0_10 = arith.constant 0 : index
    %c0_11 = arith.constant 0 : index
    %c0_12 = arith.constant 0 : index
    %15 = vector.load %arg8[%c0_10, %c0_11, %c0_12] : memref<1x1x96xf32, #tpu.memory_space<vmem>>, vector<1x1x96xf32>
    %16 = vector.shape_cast %15 : vector<1x1x96xf32> to vector<1x96xf32>
    %17 = vector.broadcast %16 : vector<1x96xf32> to vector<16x96xf32>
    %18 = arith.addf %14, %17 : vector<16x96xf32>
    %19 = vector.extract_strided_slice %18 {offsets = [0, 0], sizes = [16, 32], strides = [1, 1]} : vector<16x96xf32> to vector<16x32xf32>
    %20 = vector.extract_strided_slice %18 {offsets = [0, 32], sizes = [16, 32], strides = [1, 1]} : vector<16x96xf32> to vector<16x32xf32>
    %21 = vector.extract_strided_slice %18 {offsets = [0, 64], sizes = [16, 32], strides = [1, 1]} : vector<16x96xf32> to vector<16x32xf32>
    %22 = vector.extract_strided_slice %19 {offsets = [0, 0], sizes = [16, 8], strides = [1, 1]} : vector<16x32xf32> to vector<16x8xf32>
    %23 = vector.shape_cast %22 : vector<16x8xf32> to vector<2x8x8xf32>
    %24 = arith.truncf %23 : vector<2x8x8xf32> to vector<2x8x8xbf16>
    %25 = vector.extract_strided_slice %20 {offsets = [0, 0], sizes = [16, 8], strides = [1, 1]} : vector<16x32xf32> to vector<16x8xf32>
    %26 = vector.shape_cast %25 : vector<16x8xf32> to vector<2x8x8xf32>
    %27 = arith.truncf %26 : vector<2x8x8xf32> to vector<2x8x8xbf16>
    %28 = vector.extract_strided_slice %21 {offsets = [0, 0], sizes = [16, 8], strides = [1, 1]} : vector<16x32xf32> to vector<16x8xf32>
    %29 = vector.shape_cast %28 : vector<16x8xf32> to vector<2x8x8xf32>
    %30 = arith.truncf %29 : vector<2x8x8xf32> to vector<2x8x8xbf16>
    "tpu.trace_start"() <{level = 10 : i32, message = "bqd,bkd->bqk"}> : () -> ()
    %cst_13 = arith.constant dense<0.000000e+00> : vector<2x8x8xf32>
    %31 = tpu.matmul %24, %27, %cst_13 {dimension_numbers = #tpu.dot_dimension_numbers<[2], [2], [1], [1], [0, 0, 0, 1, 1, 1], [0], [0]>} : vector<2x8x8xbf16>, vector<2x8x8xbf16>, vector<2x8x8xf32> -> vector<2x8x8xf32>
    "tpu.trace_stop"() : () -> ()
    %32 = arith.addf %31, %11 : vector<2x8x8xf32>
    %cst_14 = arith.constant dense<0xFF800000> : vector<2x8xf32>
    %33 = vector.multi_reduction <maximumf>, %32, %cst_14 [2] : vector<2x8x8xf32> to vector<2x8xf32>
    %34 = vector.shape_cast %33 : vector<2x8xf32> to vector<2x8x1xf32>
    %35 = vector.broadcast %34 : vector<2x8x1xf32> to vector<2x8x8xf32>
    %36 = arith.subf %32, %35 : vector<2x8x8xf32>
    %37 = math.exp %36 : vector<2x8x8xf32>
    %cst_15 = arith.constant dense<0.000000e+00> : vector<2x8xf32>
    %38 = vector.multi_reduction <add>, %37, %cst_15 [2] : vector<2x8x8xf32> to vector<2x8xf32>
    %39 = vector.shape_cast %38 : vector<2x8xf32> to vector<2x8x1xf32>
    %40 = tpu.reciprocal %39 {approx = true} : vector<2x8x1xf32> -> vector<2x8x1xf32>
    %41 = vector.broadcast %40 : vector<2x8x1xf32> to vector<2x8x8xf32>
    %42 = arith.mulf %37, %41 : vector<2x8x8xf32>
    %43 = arith.truncf %42 : vector<2x8x8xf32> to vector<2x8x8xbf16>
    "tpu.trace_start"() <{level = 10 : i32, message = "bqk,bkd->bqd"}> : () -> ()
    %cst_16 = arith.constant dense<0.000000e+00> : vector<2x8x8xf32>
    %44 = tpu.matmul %43, %30, %cst_16 {dimension_numbers = #tpu.dot_dimension_numbers<[2], [1], [1], [2], [0, 0, 0, 1, 1, 2], [0], [0]>} : vector<2x8x8xbf16>, vector<2x8x8xbf16>, vector<2x8x8xf32> -> vector<2x8x8xf32>
    "tpu.trace_stop"() : () -> ()
    %45 = vector.shape_cast %44 : vector<2x8x8xf32> to vector<16x8xf32>
    %46 = vector.extract_strided_slice %19 {offsets = [0, 8], sizes = [16, 8], strides = [1, 1]} : vector<16x32xf32> to vector<16x8xf32>
    %47 = vector.shape_cast %46 : vector<16x8xf32> to vector<2x8x8xf32>
    %48 = arith.truncf %47 : vector<2x8x8xf32> to vector<2x8x8xbf16>
    %49 = vector.extract_strided_slice %20 {offsets = [0, 8], sizes = [16, 8], strides = [1, 1]} : vector<16x32xf32> to vector<16x8xf32>
    %50 = vector.shape_cast %49 : vector<16x8xf32> to vector<2x8x8xf32>
    %51 = arith.truncf %50 : vector<2x8x8xf32> to vector<2x8x8xbf16>
    %52 = vector.extract_strided_slice %21 {offsets = [0, 8], sizes = [16, 8], strides = [1, 1]} : vector<16x32xf32> to vector<16x8xf32>
    %53 = vector.shape_cast %52 : vector<16x8xf32> to vector<2x8x8xf32>
    %54 = arith.truncf %53 : vector<2x8x8xf32> to vector<2x8x8xbf16>
    "tpu.trace_start"() <{level = 10 : i32, message = "bqd,bkd->bqk"}> : () -> ()
    %cst_17 = arith.constant dense<0.000000e+00> : vector<2x8x8xf32>
    %55 = tpu.matmul %48, %51, %cst_17 {dimension_numbers = #tpu.dot_dimension_numbers<[2], [2], [1], [1], [0, 0, 0, 1, 1, 1], [0], [0]>} : vector<2x8x8xbf16>, vector<2x8x8xbf16>, vector<2x8x8xf32> -> vector<2x8x8xf32>
    "tpu.trace_stop"() : () -> ()
    %56 = arith.addf %55, %11 : vector<2x8x8xf32>
    %cst_18 = arith.constant dense<0xFF800000> : vector<2x8xf32>
    %57 = vector.multi_reduction <maximumf>, %56, %cst_18 [2] : vector<2x8x8xf32> to vector<2x8xf32>
    %58 = vector.shape_cast %57 : vector<2x8xf32> to vector<2x8x1xf32>
    %59 = vector.broadcast %58 : vector<2x8x1xf32> to vector<2x8x8xf32>
    %60 = arith.subf %56, %59 : vector<2x8x8xf32>
    %61 = math.exp %60 : vector<2x8x8xf32>
    %cst_19 = arith.constant dense<0.000000e+00> : vector<2x8xf32>
    %62 = vector.multi_reduction <add>, %61, %cst_19 [2] : vector<2x8x8xf32> to vector<2x8xf32>
    %63 = vector.shape_cast %62 : vector<2x8xf32> to vector<2x8x1xf32>
    %64 = tpu.reciprocal %63 {approx = true} : vector<2x8x1xf32> -> vector<2x8x1xf32>
    %65 = vector.broadcast %64 : vector<2x8x1xf32> to vector<2x8x8xf32>
    %66 = arith.mulf %61, %65 : vector<2x8x8xf32>
    %67 = arith.truncf %66 : vector<2x8x8xf32> to vector<2x8x8xbf16>
    "tpu.trace_start"() <{level = 10 : i32, message = "bqk,bkd->bqd"}> : () -> ()
    %cst_20 = arith.constant dense<0.000000e+00> : vector<2x8x8xf32>
    %68 = tpu.matmul %67, %54, %cst_20 {dimension_numbers = #tpu.dot_dimension_numbers<[2], [1], [1], [2], [0, 0, 0, 1, 1, 2], [0], [0]>} : vector<2x8x8xbf16>, vector<2x8x8xbf16>, vector<2x8x8xf32> -> vector<2x8x8xf32>
    "tpu.trace_stop"() : () -> ()
    %69 = vector.shape_cast %68 : vector<2x8x8xf32> to vector<16x8xf32>
    %70 = vector.extract_strided_slice %19 {offsets = [0, 16], sizes = [16, 8], strides = [1, 1]} : vector<16x32xf32> to vector<16x8xf32>
    %71 = vector.shape_cast %70 : vector<16x8xf32> to vector<2x8x8xf32>
    %72 = arith.truncf %71 : vector<2x8x8xf32> to vector<2x8x8xbf16>
    %73 = vector.extract_strided_slice %20 {offsets = [0, 16], sizes = [16, 8], strides = [1, 1]} : vector<16x32xf32> to vector<16x8xf32>
    %74 = vector.shape_cast %73 : vector<16x8xf32> to vector<2x8x8xf32>
    %75 = arith.truncf %74 : vector<2x8x8xf32> to vector<2x8x8xbf16>
    %76 = vector.extract_strided_slice %21 {offsets = [0, 16], sizes = [16, 8], strides = [1, 1]} : vector<16x32xf32> to vector<16x8xf32>
    %77 = vector.shape_cast %76 : vector<16x8xf32> to vector<2x8x8xf32>
    %78 = arith.truncf %77 : vector<2x8x8xf32> to vector<2x8x8xbf16>
    "tpu.trace_start"() <{level = 10 : i32, message = "bqd,bkd->bqk"}> : () -> ()
    %cst_21 = arith.constant dense<0.000000e+00> : vector<2x8x8xf32>
    %79 = tpu.matmul %72, %75, %cst_21 {dimension_numbers = #tpu.dot_dimension_numbers<[2], [2], [1], [1], [0, 0, 0, 1, 1, 1], [0], [0]>} : vector<2x8x8xbf16>, vector<2x8x8xbf16>, vector<2x8x8xf32> -> vector<2x8x8xf32>
    "tpu.trace_stop"() : () -> ()
    %80 = arith.addf %79, %11 : vector<2x8x8xf32>
    %cst_22 = arith.constant dense<0xFF800000> : vector<2x8xf32>
    %81 = vector.multi_reduction <maximumf>, %80, %cst_22 [2] : vector<2x8x8xf32> to vector<2x8xf32>
    %82 = vector.shape_cast %81 : vector<2x8xf32> to vector<2x8x1xf32>
    %83 = vector.broadcast %82 : vector<2x8x1xf32> to vector<2x8x8xf32>
    %84 = arith.subf %80, %83 : vector<2x8x8xf32>
    %85 = math.exp %84 : vector<2x8x8xf32>
    %cst_23 = arith.constant dense<0.000000e+00> : vector<2x8xf32>
    %86 = vector.multi_reduction <add>, %85, %cst_23 [2] : vector<2x8x8xf32> to vector<2x8xf32>
    %87 = vector.shape_cast %86 : vector<2x8xf32> to vector<2x8x1xf32>
    %88 = tpu.reciprocal %87 {approx = true} : vector<2x8x1xf32> -> vector<2x8x1xf32>
    %89 = vector.broadcast %88 : vector<2x8x1xf32> to vector<2x8x8xf32>
    %90 = arith.mulf %85, %89 : vector<2x8x8xf32>
    %91 = arith.truncf %90 : vector<2x8x8xf32> to vector<2x8x8xbf16>
    "tpu.trace_start"() <{level = 10 : i32, message = "bqk,bkd->bqd"}> : () -> ()
    %cst_24 = arith.constant dense<0.000000e+00> : vector<2x8x8xf32>
    %92 = tpu.matmul %91, %78, %cst_24 {dimension_numbers = #tpu.dot_dimension_numbers<[2], [1], [1], [2], [0, 0, 0, 1, 1, 2], [0], [0]>} : vector<2x8x8xbf16>, vector<2x8x8xbf16>, vector<2x8x8xf32> -> vector<2x8x8xf32>
    "tpu.trace_stop"() : () -> ()
    %93 = vector.shape_cast %92 : vector<2x8x8xf32> to vector<16x8xf32>
    %94 = vector.extract_strided_slice %19 {offsets = [0, 24], sizes = [16, 8], strides = [1, 1]} : vector<16x32xf32> to vector<16x8xf32>
    %95 = vector.shape_cast %94 : vector<16x8xf32> to vector<2x8x8xf32>
    %96 = arith.truncf %95 : vector<2x8x8xf32> to vector<2x8x8xbf16>
    %97 = vector.extract_strided_slice %20 {offsets = [0, 24], sizes = [16, 8], strides = [1, 1]} : vector<16x32xf32> to vector<16x8xf32>
    %98 = vector.shape_cast %97 : vector<16x8xf32> to vector<2x8x8xf32>
    %99 = arith.truncf %98 : vector<2x8x8xf32> to vector<2x8x8xbf16>
    %100 = vector.extract_strided_slice %21 {offsets = [0, 24], sizes = [16, 8], strides = [1, 1]} : vector<16x32xf32> to vector<16x8xf32>
    %101 = vector.shape_cast %100 : vector<16x8xf32> to vector<2x8x8xf32>
    %102 = arith.truncf %101 : vector<2x8x8xf32> to vector<2x8x8xbf16>
    "tpu.trace_start"() <{level = 10 : i32, message = "bqd,bkd->bqk"}> : () -> ()
    %cst_25 = arith.constant dense<0.000000e+00> : vector<2x8x8xf32>
    %103 = tpu.matmul %96, %99, %cst_25 {dimension_numbers = #tpu.dot_dimension_numbers<[2], [2], [1], [1], [0, 0, 0, 1, 1, 1], [0], [0]>} : vector<2x8x8xbf16>, vector<2x8x8xbf16>, vector<2x8x8xf32> -> vector<2x8x8xf32>
    "tpu.trace_stop"() : () -> ()
    %104 = arith.addf %103, %11 : vector<2x8x8xf32>
    %cst_26 = arith.constant dense<0xFF800000> : vector<2x8xf32>
    %105 = vector.multi_reduction <maximumf>, %104, %cst_26 [2] : vector<2x8x8xf32> to vector<2x8xf32>
    %106 = vector.shape_cast %105 : vector<2x8xf32> to vector<2x8x1xf32>
    %107 = vector.broadcast %106 : vector<2x8x1xf32> to vector<2x8x8xf32>
    %108 = arith.subf %104, %107 : vector<2x8x8xf32>
    %109 = math.exp %108 : vector<2x8x8xf32>
    %cst_27 = arith.constant dense<0.000000e+00> : vector<2x8xf32>
    %110 = vector.multi_reduction <add>, %109, %cst_27 [2] : vector<2x8x8xf32> to vector<2x8xf32>
    %111 = vector.shape_cast %110 : vector<2x8xf32> to vector<2x8x1xf32>
    %112 = tpu.reciprocal %111 {approx = true} : vector<2x8x1xf32> -> vector<2x8x1xf32>
    %113 = vector.broadcast %112 : vector<2x8x1xf32> to vector<2x8x8xf32>
    %114 = arith.mulf %109, %113 : vector<2x8x8xf32>
    %115 = arith.truncf %114 : vector<2x8x8xf32> to vector<2x8x8xbf16>
    "tpu.trace_start"() <{level = 10 : i32, message = "bqk,bkd->bqd"}> : () -> ()
    %cst_28 = arith.constant dense<0.000000e+00> : vector<2x8x8xf32>
    %116 = tpu.matmul %115, %102, %cst_28 {dimension_numbers = #tpu.dot_dimension_numbers<[2], [1], [1], [2], [0, 0, 0, 1, 1, 2], [0], [0]>} : vector<2x8x8xbf16>, vector<2x8x8xbf16>, vector<2x8x8xf32> -> vector<2x8x8xf32>
    "tpu.trace_stop"() : () -> ()
    %117 = vector.shape_cast %116 : vector<2x8x8xf32> to vector<16x8xf32>
    %118 = tpu.concatenate %45, %69, %93, %117 in 1 : vector<16x8xf32>, vector<16x8xf32>, vector<16x8xf32>, vector<16x8xf32> -> vector<16x32xf32>
    %119 = arith.truncf %118 : vector<16x32xf32> to vector<16x32xbf16>
    %c0_29 = arith.constant 0 : index
    %c0_30 = arith.constant 0 : index
    %c0_31 = arith.constant 0 : index
    %120 = vector.load %arg9[%c0_29, %c0_30, %c0_31] : memref<1x32x32xbf16, #tpu.memory_space<vmem>>, vector<1x32x32xbf16>
    %121 = vector.shape_cast %120 : vector<1x32x32xbf16> to vector<32x32xbf16>
    %cst_32 = arith.constant dense<0.000000e+00> : vector<16x32xf32>
    %122 = tpu.matmul %119, %121, %cst_32 {dimension_numbers = #tpu.dot_dimension_numbers<[1], [0], [0], [1], [0, 0, 1, 1], [], []>} : vector<16x32xbf16>, vector<32x32xbf16>, vector<16x32xf32> -> vector<16x32xf32>
    %c0_33 = arith.constant 0 : index
    %c0_34 = arith.constant 0 : index
    %c0_35 = arith.constant 0 : index
    %123 = vector.load %arg10[%c0_33, %c0_34, %c0_35] : memref<1x1x32xf32, #tpu.memory_space<vmem>>, vector<1x1x32xf32>
    %124 = vector.shape_cast %123 : vector<1x1x32xf32> to vector<1x32xf32>
    %125 = vector.broadcast %124 : vector<1x32xf32> to vector<16x32xf32>
    %126 = arith.addf %122, %125 : vector<16x32xf32>
    %127 = arith.addf %3, %126 : vector<16x32xf32>
    %c0_36 = arith.constant 0 : index
    %c0_37 = arith.constant 0 : index
    %c0_38 = arith.constant 0 : index
    %128 = vector.load %arg11[%c0_36, %c0_37, %c0_38] : memref<1x1x32xf32, #tpu.memory_space<vmem>>, vector<1x1x32xf32>
    %129 = vector.shape_cast %128 : vector<1x1x32xf32> to vector<1x32xf32>
    %c0_39 = arith.constant 0 : index
    %c0_40 = arith.constant 0 : index
    %c0_41 = arith.constant 0 : index
    %130 = vector.load %arg12[%c0_39, %c0_40, %c0_41] : memref<1x1x32xf32, #tpu.memory_space<vmem>>, vector<1x1x32xf32>
    %131 = vector.shape_cast %130 : vector<1x1x32xf32> to vector<1x32xf32>
    %cst_42 = arith.constant dense<0.000000e+00> : vector<16xf32>
    %132 = vector.multi_reduction <add>, %127, %cst_42 [1] : vector<16x32xf32> to vector<16xf32>
    %133 = vector.shape_cast %132 : vector<16xf32> to vector<16x1xf32>
    %cst_43 = arith.constant 3.200000e+01 : f32
    %134 = vector.broadcast %cst_43 : f32 to vector<16x1xf32>
    %135 = arith.divf %133, %134 : vector<16x1xf32>
    %136 = vector.broadcast %135 : vector<16x1xf32> to vector<16x32xf32>
    %137 = arith.subf %127, %136 : vector<16x32xf32>
    %138 = arith.mulf %137, %137 : vector<16x32xf32>
    %cst_44 = arith.constant dense<0.000000e+00> : vector<16xf32>
    %139 = vector.multi_reduction <add>, %138, %cst_44 [1] : vector<16x32xf32> to vector<16xf32>
    %140 = vector.shape_cast %139 : vector<16xf32> to vector<16x1xf32>
    %cst_45 = arith.constant 3.200000e+01 : f32
    %141 = vector.broadcast %cst_45 : f32 to vector<16x1xf32>
    %142 = arith.divf %140, %141 : vector<16x1xf32>
    %cst_46 = arith.constant 9.99999996E-13 : f32
    %143 = vector.broadcast %cst_46 : f32 to vector<16x1xf32>
    %144 = arith.addf %142, %143 : vector<16x1xf32>
    %145 = math.rsqrt %144 : vector<16x1xf32>
    %146 = vector.broadcast %135 : vector<16x1xf32> to vector<16x32xf32>
    %147 = arith.subf %127, %146 : vector<16x32xf32>
    %148 = vector.broadcast %145 : vector<16x1xf32> to vector<16x32xf32>
    %149 = arith.mulf %147, %148 : vector<16x32xf32>
    %150 = vector.broadcast %129 : vector<1x32xf32> to vector<16x32xf32>
    %151 = arith.mulf %149, %150 : vector<16x32xf32>
    %152 = vector.broadcast %131 : vector<1x32xf32> to vector<16x32xf32>
    %153 = arith.addf %151, %152 : vector<16x32xf32>
    %154 = arith.truncf %153 : vector<16x32xf32> to vector<16x32xbf16>
    %c0_47 = arith.constant 0 : index
    %c0_48 = arith.constant 0 : index
    %c0_49 = arith.constant 0 : index
    %155 = vector.load %arg13[%c0_47, %c0_48, %c0_49] : memref<1x32x128xbf16, #tpu.memory_space<vmem>>, vector<1x32x128xbf16>
    %156 = vector.shape_cast %155 : vector<1x32x128xbf16> to vector<32x128xbf16>
    %cst_50 = arith.constant dense<0.000000e+00> : vector<16x128xf32>
    %157 = tpu.matmul %154, %156, %cst_50 {dimension_numbers = #tpu.dot_dimension_numbers<[1], [0], [0], [1], [0, 0, 1, 1], [], []>} : vector<16x32xbf16>, vector<32x128xbf16>, vector<16x128xf32> -> vector<16x128xf32>
    %c0_51 = arith.constant 0 : index
    %c0_52 = arith.constant 0 : index
    %c0_53 = arith.constant 0 : index
    %158 = vector.load %arg14[%c0_51, %c0_52, %c0_53] : memref<1x1x128xf32, #tpu.memory_space<vmem>>, vector<1x1x128xf32>
    %159 = vector.shape_cast %158 : vector<1x1x128xf32> to vector<1x128xf32>
    %160 = vector.broadcast %159 : vector<1x128xf32> to vector<16x128xf32>
    %161 = arith.addf %157, %160 : vector<16x128xf32>
    %162 = arith.mulf %161, %161 : vector<16x128xf32>
    %163 = arith.mulf %161, %162 : vector<16x128xf32>
    %cst_54 = arith.constant 4.471500e-02 : f32
    %164 = vector.broadcast %cst_54 : f32 to vector<16x128xf32>
    %165 = arith.mulf %164, %163 : vector<16x128xf32>
    %166 = arith.addf %161, %165 : vector<16x128xf32>
    %cst_55 = arith.constant 0.797884583 : f32
    %167 = vector.broadcast %cst_55 : f32 to vector<16x128xf32>
    %168 = arith.mulf %167, %166 : vector<16x128xf32>
    %169 = math.tanh %168 : vector<16x128xf32>
    %cst_56 = arith.constant 1.000000e+00 : f32
    %170 = vector.broadcast %cst_56 : f32 to vector<16x128xf32>
    %171 = arith.addf %170, %169 : vector<16x128xf32>
    %cst_57 = arith.constant 5.000000e-01 : f32
    %172 = vector.broadcast %cst_57 : f32 to vector<16x128xf32>
    %173 = arith.mulf %172, %171 : vector<16x128xf32>
    %174 = arith.mulf %161, %173 : vector<16x128xf32>
    %175 = arith.truncf %174 : vector<16x128xf32> to vector<16x128xbf16>
    %c0_58 = arith.constant 0 : index
    %c0_59 = arith.constant 0 : index
    %c0_60 = arith.constant 0 : index
    %176 = vector.load %arg15[%c0_58, %c0_59, %c0_60] : memref<1x128x32xbf16, #tpu.memory_space<vmem>>, vector<1x128x32xbf16>
    %177 = vector.shape_cast %176 : vector<1x128x32xbf16> to vector<128x32xbf16>
    %cst_61 = arith.constant dense<0.000000e+00> : vector<16x32xf32>
    %178 = tpu.matmul %175, %177, %cst_61 {dimension_numbers = #tpu.dot_dimension_numbers<[1], [0], [0], [1], [0, 0, 1, 1], [], []>} : vector<16x128xbf16>, vector<128x32xbf16>, vector<16x32xf32> -> vector<16x32xf32>
    %c0_62 = arith.constant 0 : index
    %c0_63 = arith.constant 0 : index
    %c0_64 = arith.constant 0 : index
    %179 = vector.load %arg16[%c0_62, %c0_63, %c0_64] : memref<1x1x32xf32, #tpu.memory_space<vmem>>, vector<1x1x32xf32>
    %180 = vector.shape_cast %179 : vector<1x1x32xf32> to vector<1x32xf32>
    %181 = vector.broadcast %180 : vector<1x32xf32> to vector<16x32xf32>
    %182 = arith.addf %178, %181 : vector<16x32xf32>
    %183 = arith.addf %153, %182 : vector<16x32xf32>
    %c0_65 = arith.constant 0 : index
    %c0_66 = arith.constant 0 : index
    %c0_67 = arith.constant 0 : index
    %184 = vector.load %arg17[%c0_65, %c0_66, %c0_67] : memref<1x1x32xf32, #tpu.memory_space<vmem>>, vector<1x1x32xf32>
    %185 = vector.shape_cast %184 : vector<1x1x32xf32> to vector<1x32xf32>
    %c0_68 = arith.constant 0 : index
    %c0_69 = arith.constant 0 : index
    %c0_70 = arith.constant 0 : index
    %186 = vector.load %arg18[%c0_68, %c0_69, %c0_70] : memref<1x1x32xf32, #tpu.memory_space<vmem>>, vector<1x1x32xf32>
    %187 = vector.shape_cast %186 : vector<1x1x32xf32> to vector<1x32xf32>
    %cst_71 = arith.constant dense<0.000000e+00> : vector<16xf32>
    %188 = vector.multi_reduction <add>, %183, %cst_71 [1] : vector<16x32xf32> to vector<16xf32>
    %189 = vector.shape_cast %188 : vector<16xf32> to vector<16x1xf32>
    %cst_72 = arith.constant 3.200000e+01 : f32
    %190 = vector.broadcast %cst_72 : f32 to vector<16x1xf32>
    %191 = arith.divf %189, %190 : vector<16x1xf32>
    %192 = vector.broadcast %191 : vector<16x1xf32> to vector<16x32xf32>
    %193 = arith.subf %183, %192 : vector<16x32xf32>
    %194 = arith.mulf %193, %193 : vector<16x32xf32>
    %cst_73 = arith.constant dense<0.000000e+00> : vector<16xf32>
    %195 = vector.multi_reduction <add>, %194, %cst_73 [1] : vector<16x32xf32> to vector<16xf32>
    %196 = vector.shape_cast %195 : vector<16xf32> to vector<16x1xf32>
    %cst_74 = arith.constant 3.200000e+01 : f32
    %197 = vector.broadcast %cst_74 : f32 to vector<16x1xf32>
    %198 = arith.divf %196, %197 : vector<16x1xf32>
    %cst_75 = arith.constant 9.99999996E-13 : f32
    %199 = vector.broadcast %cst_75 : f32 to vector<16x1xf32>
    %200 = arith.addf %198, %199 : vector<16x1xf32>
    %201 = math.rsqrt %200 : vector<16x1xf32>
    %202 = vector.broadcast %191 : vector<16x1xf32> to vector<16x32xf32>
    %203 = arith.subf %183, %202 : vector<16x32xf32>
    %204 = vector.broadcast %201 : vector<16x1xf32> to vector<16x32xf32>
    %205 = arith.mulf %203, %204 : vector<16x32xf32>
    %206 = vector.broadcast %185 : vector<1x32xf32> to vector<16x32xf32>
    %207 = arith.mulf %205, %206 : vector<16x32xf32>
    %208 = vector.broadcast %187 : vector<1x32xf32> to vector<16x32xf32>
    %209 = arith.addf %207, %208 : vector<16x32xf32>
    %c0_76 = arith.constant 0 : index
    %c0_77 = arith.constant 0 : index
    %210 = vector.load %arg20[%c0_76, %c0_77] : memref<16x32xf32, #tpu.memory_space<vmem>>, vector<16x32xf32>
    tpu.vector_store %arg20[%c0_76, %c0_77], %209 {strides = array<i32>} : memref<16x32xf32, #tpu.memory_space<vmem>>, vector<16x32xf32>,
    %c1_i32 = arith.constant 1 : i32
    %211 = arith.cmpi eq, %arg0, %c1_i32 : i32
    %212 = arith.extui %211 : i1 to i32
    %c0_i32_78 = arith.constant 0 : i32
    %213 = arith.cmpi ne, %212, %c0_i32_78 : i32
    scf.if %213 {
      %c0_79 = arith.constant 0 : index
      %c0_80 = arith.constant 0 : index
      %214 = vector.load %arg19[%c0_79, %c0_80] : memref<16x32xf32, #tpu.memory_space<vmem>>, vector<16x32xf32>
      tpu.vector_store %arg19[%c0_79, %c0_80], %209 {strides = array<i32>} : memref<16x32xf32, #tpu.memory_space<vmem>>, vector<16x32xf32>,
    } else {
    }
    return
  }
  func.func @transform_0(%arg0: i32) -> (i32, i32) {
    %c0_i32 = arith.constant 0 : i32
    %c0_i32_0 = arith.constant 0 : i32
    %c0_i32_1 = arith.constant 0 : i32
    return %c0_i32, %c0_i32_0 : i32, i32
  }
  func.func @transform_1(%arg0: i32) -> (i32, i32, i32) {
    %c0_i32 = arith.constant 0 : i32
    %c0_i32_0 = arith.constant 0 : i32
    %c0_i32_1 = arith.constant 0 : i32
    %c0_i32_2 = arith.constant 0 : i32
    return %c0_i32, %c0_i32_0, %c0_i32_1 : i32, i32, i32
  }
  func.func @transform_2(%arg0: i32) -> (i32, i32) {
    %c0_i32 = arith.constant 0 : i32
    %c0_i32_0 = arith.constant 0 : i32
    %c0_i32_1 = arith.constant 0 : i32
    return %c0_i32, %c0_i32_0 : i32, i32
  }
  func.func @transform_3(%arg0: i32) -> (i32, i32) {
    %c0_i32 = arith.constant 0 : i32
    %c0_i32_0 = arith.constant 0 : i32
    %c0_i32_1 = arith.constant 0 : i32
    return %c0_i32, %c0_i32_0 : i32, i32
  }
  func.func @transform_4(%arg0: i32) -> (i32, i32) {
    %c0_i32 = arith.constant 0 : i32
    %c0_i32_0 = arith.constant 0 : i32
    %c0_i32_1 = arith.constant 0 : i32
    return %c0_i32, %c0_i32_0 : i32, i32
  }
  func.func @transform_5(%arg0: i32) -> (i32, i32) {
    %c0_i32 = arith.constant 0 : i32
    %c0_i32_0 = arith.constant 0 : i32
    %c0_i32_1 = arith.constant 0 : i32
    return %c0_i32, %c0_i32_0 : i32, i32
  }
  func.func @transform_6(%arg0: i32) -> (i32, i32, i32) {
    %c0_i32 = arith.constant 0 : i32
    %c0_i32_0 = arith.constant 0 : i32
    %c0_i32_1 = arith.constant 0 : i32
    return %arg0, %c0_i32, %c0_i32_0 : i32, i32, i32
  }
  func.func @transform_7(%arg0: i32) -> (i32, i32, i32) {
    %c0_i32 = arith.constant 0 : i32
    %c0_i32_0 = arith.constant 0 : i32
    %c0_i32_1 = arith.constant 0 : i32
    return %arg0, %c0_i32, %c0_i32_0 : i32, i32, i32
  }
  func.func @transform_8(%arg0: i32) -> (i32, i32, i32) {
    %c0_i32 = arith.constant 0 : i32
    %c0_i32_0 = arith.constant 0 : i32
    %c0_i32_1 = arith.constant 0 : i32
    return %arg0, %c0_i32, %c0_i32_0 : i32, i32, i32
  }
  func.func @transform_9(%arg0: i32) -> (i32, i32, i32) {
    %c0_i32 = arith.constant 0 : i32
    %c0_i32_0 = arith.constant 0 : i32
    %c0_i32_1 = arith.constant 0 : i32
    return %arg0, %c0_i32, %c0_i32_0 : i32, i32, i32
  }
  func.func @transform_10(%arg0: i32) -> (i32, i32, i32) {
    %c0_i32 = arith.constant 0 : i32
    %c0_i32_0 = arith.constant 0 : i32
    %c0_i32_1 = arith.constant 0 : i32
    return %arg0, %c0_i32, %c0_i32_0 : i32, i32, i32
  }
  func.func @transform_11(%arg0: i32) -> (i32, i32, i32) {
    %c0_i32 = arith.constant 0 : i32
    %c0_i32_0 = arith.constant 0 : i32
    %c0_i32_1 = arith.constant 0 : i32
    return %arg0, %c0_i32, %c0_i32_0 : i32, i32, i32
  }
  func.func @transform_12(%arg0: i32) -> (i32, i32, i32) {
    %c0_i32 = arith.constant 0 : i32
    %c0_i32_0 = arith.constant 0 : i32
    %c0_i32_1 = arith.constant 0 : i32
    return %arg0, %c0_i32, %c0_i32_0 : i32, i32, i32
  }
  func.func @transform_13(%arg0: i32) -> (i32, i32, i32) {
    %c0_i32 = arith.constant 0 : i32
    %c0_i32_0 = arith.constant 0 : i32
    %c0_i32_1 = arith.constant 0 : i32
    return %arg0, %c0_i32, %c0_i32_0 : i32, i32, i32
  }
  func.func @transform_14(%arg0: i32) -> (i32, i32, i32) {
    %c0_i32 = arith.constant 0 : i32
    %c0_i32_0 = arith.constant 0 : i32
    %c0_i32_1 = arith.constant 0 : i32
    return %arg0, %c0_i32, %c0_i32_0 : i32, i32, i32
  }
  func.func @transform_15(%arg0: i32) -> (i32, i32, i32) {
    %c0_i32 = arith.constant 0 : i32
    %c0_i32_0 = arith.constant 0 : i32
    %c0_i32_1 = arith.constant 0 : i32
    return %arg0, %c0_i32, %c0_i32_0 : i32, i32, i32
  }
  func.func @transform_16(%arg0: i32) -> (i32, i32, i32) {
    %c0_i32 = arith.constant 0 : i32
    %c0_i32_0 = arith.constant 0 : i32
    %c0_i32_1 = arith.constant 0 : i32
    return %arg0, %c0_i32, %c0_i32_0 : i32, i32, i32
  }
  func.func @transform_17(%arg0: i32) -> (i32, i32, i32) {
    %c0_i32 = arith.constant 0 : i32
    %c0_i32_0 = arith.constant 0 : i32
    %c0_i32_1 = arith.constant 0 : i32
    return %arg0, %c0_i32, %c0_i32_0 : i32, i32, i32
  }
  func.func @transform_18(%arg0: i32) -> (i32, i32) {
    %c0_i32 = arith.constant 0 : i32
    %c0_i32_0 = arith.constant 0 : i32
    %c0_i32_1 = arith.constant 0 : i32
    return %c0_i32, %c0_i32_0 : i32, i32
  }
}

</mosaic_0001>

<bundles_post_ra>
// kernel: bert_embedding_forward.1
= control target key start
LH: loop header
LB: loop body
LE: loop exit
PB: predicated region body
PF: predicated region fallthrough
CT: control target
= control target key end

     0   :  { %s2948_s27 = smov 0   ;;  %s3341_s0 = inlined_call_operand.vmem [shape: s32[16,1], index: 0, kind: input, shape index: {}]   ;;  %s3342_s1 = inlined_call_operand.vmem [shape: f32[2,1,8], index: 1, kind: input, shape index: {}]   ;;  %s3343_s2 = inlined_call_operand.vmem [shape: bf16[128,32], index: 2, kind: input, shape index: {}]   ;;  %s3344_s3 = inlined_call_operand.vmem [shape: f32[16,32], index: 3, kind: input, shape index: {}]   ;;  %s3345_s4 = inlined_call_operand.vmem [shape: f32[1,32], index: 4, kind: input, shape index: {}]   ;;  %s3346_s5 = inlined_call_operand.vmem [shape: f32[1,32], index: 5, kind: input, shape index: {}]   ;;  %s3347_s6 = inlined_call_operand.vmem [shape: bf16[2,32,96], index: 6, kind: input, shape index: {}]   ;;  %s3348_s7 = inlined_call_operand.vmem [shape: f32[2,1,96], index: 7, kind: input, shape index: {}]   ;;  %s3349_s8 = inlined_call_operand.vmem [shape: bf16[2,32,32], index: 8, kind: input, shape index: {}]   ;;  %s3350_s9 = inlined_call_operand.vmem [shape: f32[2,1,32], index: 9, kind: input, shape index: {}]   ;;  %s3351_s10 = inlined_call_operand.vmem [shape: f32[2,1,32], index: 10, kind: input, shape index: {}]   ;;  %s3352_s11 = inlined_call_operand.vmem [shape: f32[2,1,32], index: 11, kind: input, shape index: {}]   ;;  %s3353_s12 = inlined_call_operand.vmem [shape: bf16[2,32,128], index: 12, kind: input, shape index: {}]   ;;  %s3354_s13 = inlined_call_operand.vmem [shape: f32[2,1,128], index: 13, kind: input, shape index: {}]   ;;  %s3355_s14 = inlined_call_operand.vmem [shape: bf16[2,128,32], index: 14, kind: input, shape index: {}]   ;;  %s3356_s15 = inlined_call_operand.vmem [shape: f32[2,1,32], index: 15, kind: input, shape index: {}]   ;;  %s3357_s16 = inlined_call_operand.vmem [shape: f32[2,1,32], index: 16, kind: input, shape index: {}]   ;;  %s3358_s17 = inlined_call_operand.vmem [shape: f32[2,1,32], index: 17, kind: input, shape index: {}]   ;;  %s3359_s18 = inlined_call_operand.vmem [shape: f32[16,32], index: 18, kind: output, shape index: {}]  }
   0x1   :  { %3366 = sst [smem:[#allocation5_spill]] %s3341_s0 }
   0x2   :  { %3367 = sst [smem:[#allocation6_spill]] %s3342_s1 }
   0x3   :  { %3368 = sst [smem:[#allocation7_spill]] %s3343_s2 }
   0x4   :  { %3369 = sst [smem:[#allocation8_spill]] %s3345_s4 }
   0x5   :  { %3370 = sst [smem:[#allocation9_spill]] %s3346_s5 }
   0x6   :  { %3371 = sst [smem:[#allocation10_spill]] %s3347_s6 }
   0x7   :  { %3372 = sst [smem:[#allocation11_spill]] %s3349_s8 }
   0x8   :  { %3373 = sst [smem:[#allocation12_spill]] %s3359_s18 }
   0x9 LB: > { %3374 = sst [smem:[#allocation3_spill]] %s2831_s27  ;;  %s2954_s28 = sadd.s32 4294967295, %s2831_s27   ;;  %s2831_s27 = sphi %s2948_s27, %s28_s27  }
   0xa   : > { %p2420_p0 = scmp.ge.s32.totalorder %s2831_s27, 1  ;;  %p601_p1 = scmp.lt.s32.totalorder %s2831_s27, 3 }
   0xc   : > { %p602_p2 = pnand %p2420_p0, %p601_p1 }
   0xe   : > { %605 = sbr.rel (%p602_p2) target bundleno = 4841 (0x12e9), region = 92 }
  0x15   : > { %p689_p3 = scmp.lt.s32.totalorder %s2954_s28, 1  ;;  %s3375_s6 = sld [smem:[#allocation10_spill]] }
  0x16   : > { %s3376_s8 = sld [smem:[#allocation11_spill]]  ;;  %p2429_p4 = scmp.ne.s32.totalorder %s2954_s28, 0 }
  0x17   : > { %s2960_s29 = scalar_select %p689_p3, %s2954_s28, 1 }
  0x18   : > { %737 = sbr.rel (%p2429_p4) target bundleno = 697 (0x2b9), region = 96  ;;  %s3378_s25 = sld [smem:[#allocation5_spill]] (!%p2429_p4)  ;;  %v2833_v1 = vmov (!%p2429_p4), 0   ;;  %v2834_v2 = vmov (!%p2429_p4), 0.0   ;;  %vm2835_vm0 = vmmov (!%p2429_p4), 0   ;;  %v740_v12 = vlaneseq (!%p2429_p4)  ;;  %v771_v17 = vld [vmem:[%s3344_s3] sm:$0xff] (!%p2429_p4) }
  0x19   : > { %s2488_s30 = sshll.u32 %s2960_s29, 4  ;;  %s726_s0 = scalar_lea.vmem %s3356_s15, %s2960_s29  ;;  %2739 = vset.pattern.permute.xlu0 (!%p2429_p4), %v2833_v1  ;;  %2551 = vmatprep.subr.bf16.mxu0 (!%p2429_p4), %v2834_v2  ;;  %v2836_v16 = vmov (!%p2429_p4), 1.0|1.0   ;;  %v772_v19 = vld [vmem:[%s3344_s3 + $0x8] sm:$0xff] (!%p2429_p4)  ;;  %vm864_vm4 = vcmask (!%p2429_p4), 261120  }
  0x1a   : > { %s729_s20 = scalar_lea.vmem %s3357_s16, %s2960_s29  ;;  %s732_s4 = scalar_lea.vmem %s3358_s17, %s2960_s29  ;;  %2567 = vmatprep.mubr.msk.bf16.mxu0 (!%p2429_p4), %vm2835_vm0, %v2834_v2  ;;  %v741_v14 = vand.u32 (!%p2429_p4), 127, %v740_v12 }
  0x1b   : > { %s2970_s22 = scalar_lea.vmem %s3375_s6, %s2488_s30  ;;  %s2992_s6 = scalar_lea.vmem %s3353_s12, %s2488_s30 }
  0x1c   : > { %s2975_s24 = scalar_lea.vmem %s3376_s8, %s2488_s30  ;;  %s718_s8 = scalar_lea.vmem %s3354_s13, %s2960_s29 }
  0x1d   : > { %3377 = sst [smem:[#allocation4_spill]] %s2975_s24  ;;  %s2491_s24 = sshll.u32 %s2960_s29, 6 }
  0x1e   : > { %s3002_s27 = scalar_lea.vmem %s3355_s14, %s2491_s24  ;;  %v738_v0 = vld [vmem:[%s3378_s25] sm:$0xff] (!%p2429_p4)  ;;  %s3379_s5 = sld [smem:[#allocation7_spill]] (!%p2429_p4)  ;;  %v739_v4 = vld [vmem:[%s3378_s25 + $0x8] sm:$0xff] (!%p2429_p4) }
  0x1f   : > { %743 = vperm.xlu0 %2739, %v738_v0   ;;  %s3380_s21 = sld [smem:[#allocation8_spill]]  ;;  %s3381_s24 = sld [smem:[#allocation9_spill]] }
  0x23   : > { %746 = vperm.xlu0 %2739, %v739_v4  }
  0x24   : > { %v2740_v3 = vld [vmem:[%s3379_s5] sm:$0xff]   ;;  %v2741_v5 = vld [vmem:[%s3379_s5 + $0x8] sm:$0xff]   ;;  %v2742_v6 = vld [vmem:[%s3379_s5 + $0x10] sm:$0xff]  }
  0x25   : > { %2552 = vmatpush3.bf16.msra.mxu0 %v2740_v3  ;;  %v2743_v7 = vld [vmem:[%s3379_s5 + $0x18] sm:$0xff]   ;;  %v2744_v8 = vld [vmem:[%s3379_s5 + $0x20] sm:$0xff]   ;;  %v2745_v9 = vld [vmem:[%s3379_s5 + $0x28] sm:$0xff]  }
  0x26   : > { %2553 = vmatprep.subr.bf16.mxu0 %v2834_v2  ;;  %v2746_v10 = vld [vmem:[%s3379_s5 + $0x30] sm:$0xff]   ;;  %v2747_v11 = vld [vmem:[%s3379_s5 + $0x38] sm:$0xff]   ;;  %v2442_v44 = vld [vmem:[%s3380_s21] ss:$0 sm:$0xff] }
  0x27   : > { %v2443_v46 = vld [vmem:[%s3381_s24] ss:$0 sm:$0xff] }
  0x29   : > { %2554 = vmatpush3.bf16.msra.mxu0 %v2741_v5 }
  0x2a   : > { %2555 = vmatprep.subr.bf16.mxu0 %v2834_v2 }
  0x2d   : > { %2556 = vmatpush3.bf16.msra.mxu0 %v2742_v6 }
  0x2e   : > { %2557 = vmatprep.subr.bf16.mxu0 %v2834_v2 }
  0x31   : > { %2558 = vmatpush3.bf16.msra.mxu0 %v2743_v7 }
  0x32   : > { %2559 = vmatprep.subr.bf16.mxu0 %v2834_v2 }
  0x35   : > { %2560 = vmatpush3.bf16.msra.mxu0 %v2744_v8 }
  0x36   : > { %2561 = vmatprep.subr.bf16.mxu0 %v2834_v2 }
  0x39   : > { %2562 = vmatpush3.bf16.msra.mxu0 %v2745_v9 }
  0x3a   : > { %2563 = vmatprep.subr.bf16.mxu0 %v2834_v2 }
  0x3d   : > { %2564 = vmatpush3.bf16.msra.mxu0 %v2746_v10 }
  0x3e   : > { %2565 = vmatprep.subr.bf16.mxu0 %v2834_v2 }
  0x41   : > { %2566 = vmatpush3.bf16.msra.mxu0 %v2747_v11 }
  0x9e   : > { %v744_v13 = vpop.permute.xlu0 %743 }
  0x9f   : > { %vm748_vm1 = vcmp.eq.s32.totalorder %v744_v13, %v741_v14 }
  0xa2   : > { %v747_v15 = vpop.permute.xlu0 %746 }
  0xa3   : > { %vm749_vm2 = vcmp.eq.s32.totalorder %v747_v15, %v741_v14 }
  0xa4   : > { %vm2440_vm3 = vmpackc.low %vm749_vm2, %vm748_vm1 }
  0xa5   : > { %2568 = vmatmul.mubr.msk.bf16.vlgmr.msra.gmra.mrb[0].mxu0 %vm2440_vm3, %v2836_v16 }
 0x178   : > { %v855_v18 = vpop.f32.mrb[0].mxu0 }
 0x179   : > { %v856_v20 = vadd.f32 %v855_v18, %v771_v17  ;;  %v2569_v21 = vpop.f32.mrb[1].mxu0 }
 0x17a   : > { %v858_v22 = vpop.f32.mrb[2].mxu0 }
 0x17b   : > { %v859_v23 = vadd.f32 %v858_v22, %v772_v19  ;;  %v2570_v24 = vpop.f32.mrb[3].mxu0  ;;  %v865_v25 = vsel %vm864_vm4, %v856_v20, 0.0 }
 0x17c   : > { %866 = vadd.xlane.f32.xlu1 %v865_v25 }
 0x17d   : > { %v868_v26 = vsel %vm864_vm4, %v859_v23, 0.0 }
 0x180   : > { %869 = vadd.xlane.f32.xlu1 %v868_v26 }
 0x209   : > { %v867_v27 = vpop.xlane.xlu1 %866 }
 0x20a   : > { %v872_v28 = vmul.f32 0.03125, %v867_v27 }
 0x20c   : > { %v874_v29 = vsub.f32 %v856_v20, %v872_v28 }
 0x20d   : > { %v870_v30 = vpop.xlane.xlu1 %869 }
 0x20e   : > { %v873_v31 = vmul.f32 0.03125, %v870_v30  ;;  %v876_v32 = vmul.f32 %v874_v29, %v874_v29 }
 0x210   : > { %v875_v33 = vsub.f32 %v859_v23, %v873_v31  ;;  %v878_v34 = vsel %vm864_vm4, %v876_v32, 0.0 }
 0x211   : > { %879 = vadd.xlane.f32.xlu0 %v878_v34 }
 0x212   : > { %v877_v35 = vmul.f32 %v875_v33, %v875_v33 }
 0x214   : > { %v881_v36 = vsel %vm864_vm4, %v877_v35, 0.0 }
 0x215   : > { %882 = vadd.xlane.f32.xlu1 %v881_v36 }
 0x29e   : > { %v880_v37 = vpop.xlane.xlu0 %879 }
 0x29f   : > { %v884_v38 = vmul.f32 0.03125, %v880_v37 }
 0x2a1   : > { %v886_v39 = vadd.f32 1e-12, %v884_v38 }
 0x2a2   : > { %v883_v40 = vpop.xlane.xlu1 %882 }
 0x2a3   : > { %2748 = vrsqrt.f32 %v886_v39  ;;  %v885_v41 = vmul.f32 0.03125, %v883_v40 }
 0x2a5   : > { %v887_v42 = vadd.f32 1e-12, %v885_v41 }
 0x2a7   : > { %2750 = vrsqrt.f32 %v887_v42 }
 0x2ad   : > { %v2749_v43 = vpop.eup %2748 }
 0x2ae   : > { %v890_v45 = vmul.f32 %v2749_v43, %v874_v29 }
 0x2b0   : > { %v898_v47 = vmul.f32 %v2442_v44, %v890_v45 }
 0x2b1   : > { %v2751_v48 = vpop.eup %2750 }
 0x2b2   : > { %v906_v49 = vadd.f32 %v2443_v46, %v898_v47  ;;  %v891_v50 = vmul.f32 %v2751_v48, %v875_v33 }
 0x2b4   : > { %908 = vst.msk [vmem:[#allocation2] sm:$0xff] %vm864_vm4, %v906_v49  ;;  %v899_v51 = vmul.f32 %v2442_v44, %v891_v50 }
 0x2b6   : > { %v907_v52 = vadd.f32 %v2443_v46, %v899_v51 }
 0x2b8   : > { %909 = vst.msk [vmem:[#allocation2 + $0x8] sm:$0xff] %vm864_vm4, %v907_v52 }
 0x2b9 PF: > { %v2767_v53 = vld [vmem:[%s2970_s22] sm:$0xff]   ;;  %v2837_v54 = vmov 0.0   ;;  %v2768_v55 = vld [vmem:[%s2970_s22 + $0x8] sm:$0xff]   ;;  %vm2838_vm5 = vmmov 0   ;;  %vm954_vm6 = vcmask 261120   ;;  %s3382_s1 = scalar_lea.vmem %s3348_s7, %s2960_s29  ;;  %s2839_s18 = smov 96   ;;  %v921_v8 = vlaneseq }
 0x2ba   : > { %2571 = vmatprep.subr.bf16.mxu0 %v2837_v54  ;;  %2591 = vmatprep.subr.bf16.mxu1 %v2837_v54  ;;  %v2444_v59 = vld [vmem:[%s3382_s1] ss:$0 sm:$0xff]  ;;  %vm1004_vm7 = vcmask 64512   ;;  %s3383_s21 = sld [smem:[#allocation6_spill]]  ;;  %s2840_s24 = smov 64   ;;  %vm1129_vm8 = vcmask 1043456  }
 0x2bb   : > { %2572 = vmatpush3.bf16.msra.mxu0 %v2767_v53  ;;  %2575 = vmatprep.mubr.msk.bf16.mxu0 %vm2838_vm5, %v2837_v54  ;;  %v3071_v56 = vld [vmem:[#allocation2] sm:$0xff]  ;;  %v922_v11 = vshrl.u32 %v921_v8, 7  ;;  %s2841_s22 = smov 88   ;;  %s2842_s26 = smov 120   ;;  %vm1907_vm9 = vcmask 130048   ;;  %vm1910_vm10 = vcmask 195584  }
 0x2bc   : > { %2573 = vmatprep.subr.bf16.mxu0 %v2837_v54  ;;  %2593 = vmatprep.mubr.msk.bf16.mxu1 %vm2838_vm5, %v2837_v54  ;;  %s2843_s1 = smov 56   ;;  %s2845_s19 = smov 112  }
 0x2bd   : > { %v923_v13 = vsub.s32 0, %v922_v11  ;;  %s2846_s30 = smov 48   ;;  %s2847_s2 = smov 72  }
 0x2be   : > { %s2848_s23 = smov 104   ;;  %p2485_p5 = scmp.ne.s32.totalorder %s2954_s28, 1 }
 0x2bf   : > { %v3073_v57 = vld [vmem:[#allocation2 + $0x8] sm:$0xff]  ;;  %2574 = vmatpush3.bf16.msra.mxu0 %v2768_v55 }
 0x2c0   : > { %v912_v58 = vpack.c.bf16 %v3073_v57, %v3071_v56  ;;  %2579 = vmatprep.subr.bf16.mxu0 %v2837_v54  ;;  %v913_v9 = vld [vmem:[%s3383_s21] sm:$0x1]  ;;  %v914_v14 = vld [vmem:[%s3383_s21 + $0x1] sm:$0x1] }
 0x2c1   : > { %v915_v10 = vsub.f32 1.0, %v913_v9  ;;  %v916_v16 = vsub.f32 1.0, %v914_v14 }
 0x2c2   : > { %2576 = vmatmul.mubr.msk.bf16.vlgmr.msra.gmra.mrb[0].mxu0 %vm954_vm6, %v912_v58 }
 0x2c3   : > { %2581 = vmatprep.mubr.msk.bf16.mxu0 %vm2838_vm5, %v2837_v54  ;;  %v917_v12 = vmul.f32 -1e+09, %v915_v10  ;;  %v918_v20 = vmul.f32 -1e+09, %v916_v16 }
 0x2c5   : > { %v3113_v15 = vrot.slane %v917_v12, %v923_v13  ;;  %v3117_v24 = vrot.slane %v918_v20, %v923_v13 }
 0x395   : > { %v992_v60 = vpop.f32.mrb[0].mxu0 }
 0x396   : > { %v993_v61 = vadd.f32 %v2444_v59, %v992_v60  ;;  %v2577_v62 = vpop.f32.mrb[1].mxu0 }
 0x397   : > { %v995_v63 = vpop.f32.mrb[2].mxu0 }
 0x398   : > { %v3089_v0 = vpack.c.bf16 %v993_v61, %v993_v61  ;;  %v996_v1 = vadd.f32 %v2444_v59, %v995_v63  ;;  %v2578_v2 = vpop.f32.mrb[3].mxu0 }
 0x39a   : > { %1002 = vrot.lane.b32.xlu0 %v3089_v0, %s2839_s18  ;;  %v3092_v3 = vpack.c.bf16 %v996_v1, %v996_v1 }
 0x39e   : > { %1052 = vrot.lane.b32.xlu0 %v3092_v3, %s2839_s18  ;;  %s2844_s18 = smov 80  }
 0x40c   : > { %v1003_v4 = vpop.permute.xlu0 %1002 }
 0x40d   : > { %v1009_v5 = vsel %vm1004_vm7, %v1003_v4, 0 }
 0x40e   : > { %2580 = vmatpush3.bf16.xpose.msra.mxu0 %v1009_v5 }
 0x40f   : > { %2585 = vmatprep.subr.bf16.mxu0 %v2837_v54 }
 0x410   : > { %v1053_v6 = vpop.permute.xlu0 %1052 }
 0x411   : > { %v1058_v7 = vsel %vm1004_vm7, %v1053_v6, 0 }
 0x415   : > { %2582 = vmatmul.mubr.msk.bf16.vlgmr.msra.gmra.mrb[4].mxu0 %vm1004_vm7, %v3089_v0 }
 0x416   : > { %2586 = vmatpush3.bf16.xpose.msra.mxu0 %v1058_v7  ;;  %2587 = vmatprep.mubr.msk.bf16.mxu0 %vm2838_vm5, %v2837_v54 }
 0x417   : > { %2597 = vmatprep.subr.bf16.mxu0 %v2837_v54 }
 0x41d   : > { %2588 = vmatmul.mubr.msk.bf16.vlgmr.msra.gmra.mrb[8].mxu0 %vm1004_vm7, %v3092_v3 }
 0x41e   : > { %2599 = vmatprep.mubr.msk.bf16.mxu0 %vm2838_vm5, %v2837_v54 }
 0x4e8   : > { %v1045_v17 = vpop.f32.mrb[4].mxu0 }
 0x4e9   : > { %v1046_v18 = vadd.f32 %v1045_v17, %v3113_v15  ;;  %v2583_v19 = vpop.f32.mrb[5].mxu0 }
 0x4ea   : > { %v1048_v21 = vpop.f32.mrb[6].mxu0 }
 0x4eb   : > { %v2584_v22 = vpop.f32.mrb[7].mxu0  ;;  %v1100_v23 = vsel %vm1004_vm7, %v1046_v18, -inf }
 0x4ec   : > { %1101 = vmax.xlane.f32.xlu1 %v1100_v23 }
 0x4f0   : > { %v1094_v25 = vpop.f32.mrb[8].mxu0 }
 0x4f1   : > { %v1095_v26 = vadd.f32 %v1094_v25, %v3117_v24  ;;  %v2589_v27 = vpop.f32.mrb[9].mxu0 }
 0x4f2   : > { %v1097_v28 = vpop.f32.mrb[10].mxu0 }
 0x4f3   : > { %v2590_v29 = vpop.f32.mrb[11].mxu0  ;;  %v1103_v30 = vsel %vm1004_vm7, %v1095_v26, -inf }
 0x4f4   : > { %1104 = vmax.xlane.f32.xlu1 %v1103_v30 }
 0x505   : > { %1124 = vrot.lane.b32.xlu1 %v3089_v0, %s2840_s24 }
 0x509   : > { %1173 = vrot.lane.b32.xlu1 %v3092_v3, %s2840_s24  ;;  %s2849_s24 = smov 40  }
 0x50d   : > { %1223 = vrot.lane.b32.xlu1 %v3089_v0, %s2841_s22 }
 0x579   : > { %v1102_v31 = vpop.xlane.xlu1 %1101 }
 0x57a   : > { %v1106_v32 = vsub.f32 %v1046_v18, %v1102_v31 }
 0x57c   : > { %v1108_v33 = vmul.f32 1.442695, %v1106_v32 }
 0x57e   : > { %2781 = vpow2.f32 %v1108_v33 }
 0x581   : > { %v1105_v34 = vpop.xlane.xlu1 %1104 }
 0x582   : > { %v1107_v35 = vsub.f32 %v1095_v26, %v1105_v34 }
 0x584   : > { %v1110_v36 = vmul.f32 1.442695, %v1107_v35 }
 0x585   : > { %v1125_v37 = vpop.permute.xlu1 %1124 }
 0x586   : > { %2783 = vpow2.f32 %v1110_v36  ;;  %v1131_v38 = vsel %vm1129_vm8, %v1125_v37, 0 }
 0x587   : > { %2592 = vmatpush3.bf16.msra.mxu1 %v1131_v38 }
 0x588   : > { %v2782_v39 = vpop.eup %2781  ;;  %2603 = vmatprep.subr.bf16.mxu1 %v2837_v54 }
 0x589   : > { %v1174_v40 = vpop.permute.xlu1 %1173  ;;  %v1112_v41 = vsel %vm1004_vm7, %v2782_v39, 0.0 }
 0x58a   : > { %v1179_v42 = vsel %vm1129_vm8, %v1174_v40, 0  ;;  %1113 = vadd.xlane.f32.xlu0 %v1112_v41 }
 0x58b   : > { %2598 = vmatpush3.bf16.msra.mxu0 %v1179_v42 }
 0x58c   : > { %2609 = vmatprep.subr.bf16.mxu0 %v2837_v54 }
 0x58d   : > { %v1224_v46 = vpop.permute.xlu1 %1223 }
 0x58e   : > { %v1229_v51 = vsel %vm1004_vm7, %v1224_v46, 0 }
 0x590   : > { %v2784_v43 = vpop.eup %2783 }
 0x591   : > { %v1115_v44 = vsel %vm1004_vm7, %v2784_v43, 0.0 }
 0x592   : > { %1116 = vadd.xlane.f32.xlu1 %v1115_v44 }
 0x5a0   : > { %1221 = vrot.lane.b32.xlu0 %v3089_v0, %s2842_s26 }
 0x5a3   : > { %1273 = vrot.lane.b32.xlu1 %v3092_v3, %s2841_s22  ;;  %s2850_s22 = smov 8  }
 0x5a7   : > { %1271 = vrot.lane.b32.xlu1 %v3092_v3, %s2842_s26  ;;  %s2851_s26 = smov 16  }
 0x617   : > { %v1114_v45 = vpop.xlane.xlu0 %1113 }
 0x618   : > { %2785 = vrcp.f32 %v1114_v45 }
 0x61b   : > { %v1222_v59 = vpop.permute.xlu0 %1221 }
 0x61f   : > { %v1117_v47 = vpop.xlane.xlu1 %1116 }
 0x620   : > { %2787 = vrcp.f32 %v1117_v47 }
 0x622   : > { %v2786_v48 = vpop.eup %2785 }
 0x623   : > { %v1120_v49 = vmul.f32 %v2786_v48, %v2782_v39  ;;  %v1274_v55 = vpop.permute.xlu1 %1273 }
 0x624   : > { %v1279_v60 = vsel %vm1004_vm7, %v1274_v55, 0 }
 0x625   : > { %v1122_v50 = vpack.c.bf16 %v1120_v49, %v1120_v49 }
 0x627   : > { %2594 = vmatmul.mubr.msk.bf16.vlgmr.msra.gmra.mrb[0].mxu1 %vm1004_vm7, %v1122_v50  ;;  %v1272_v61 = vpop.permute.xlu1 %1271 }
 0x628   : > { %2604 = vmatpush3.bf16.xpose.msra.mxu1 %v1229_v51  ;;  %2605 = vmatprep.mubr.msk.bf16.mxu1 %vm2838_vm5, %v2837_v54 }
 0x629   : > { %2615 = vmatprep.subr.bf16.mxu1 %v2837_v54 }
 0x62a   : > { %v2788_v52 = vpop.eup %2787 }
 0x62b   : > { %v1121_v53 = vmul.f32 %v2788_v52, %v2784_v43 }
 0x62d   : > { %v1123_v58 = vpack.c.bf16 %v1121_v53, %v1121_v53 }
 0x62f   : > { %2600 = vmatmul.mubr.msk.bf16.vlgmr.msra.gmra.mrb[12].mxu0 %vm1004_vm7, %v1123_v58  ;;  %2606 = vmatmul.mubr.msk.bf16.vlgmr.msra.gmra.mrb[4].mxu1 %vm1004_vm7, %v1222_v59 }
 0x630   : > { %2610 = vmatpush3.bf16.xpose.msra.mxu0 %v1279_v60  ;;  %2611 = vmatprep.mubr.msk.bf16.mxu0 %vm2838_vm5, %v2837_v54 }
 0x631   : > { %2621 = vmatprep.subr.bf16.mxu0 %v2837_v54  ;;  %2617 = vmatprep.mubr.msk.bf16.mxu1 %vm2838_vm5, %v2837_v54 }
 0x637   : > { %2612 = vmatmul.mubr.msk.bf16.vlgmr.msra.gmra.mrb[16].mxu0 %vm1004_vm7, %v1272_v61 }
 0x638   : > { %2623 = vmatprep.mubr.msk.bf16.mxu0 %vm2838_vm5, %v2837_v54 }
 0x6fa   : > { %v3149_v62 = vpop.f32.mrb[0].mxu1 }
 0x6fb   : > { %v2595_v63 = vpop.f32.mrb[1].mxu1 }
 0x6fc   : > { %v1170_v1 = vpop.f32.mrb[2].mxu1 }
 0x6fd   : > { %v2596_v2 = vpop.f32.mrb[3].mxu1 }
 0x702   : > { %v3151_v4 = vpop.f32.mrb[12].mxu0  ;;  %v1265_v5 = vpop.f32.mrb[4].mxu1 }
 0x703   : > { %v1266_v6 = vadd.f32 %v1265_v5, %v3113_v15  ;;  %v2601_v7 = vpop.f32.mrb[13].mxu0  ;;  %v2607_v8 = vpop.f32.mrb[5].mxu1 }
 0x704   : > { %v1218_v9 = vpop.f32.mrb[14].mxu0  ;;  %v1268_v10 = vpop.f32.mrb[6].mxu1 }
 0x705   : > { %v2602_v11 = vpop.f32.mrb[15].mxu0  ;;  %v2608_v12 = vpop.f32.mrb[7].mxu1  ;;  %v1321_v13 = vsel %vm1004_vm7, %v1266_v6, -inf }
 0x706   : > { %1322 = vmax.xlane.f32.xlu1 %v1321_v13 }
 0x70a   : > { %v1315_v14 = vpop.f32.mrb[16].mxu0 }
 0x70b   : > { %v1316_v16 = vadd.f32 %v1315_v14, %v3117_v24  ;;  %v2613_v17 = vpop.f32.mrb[17].mxu0 }
 0x70c   : > { %v1318_v18 = vpop.f32.mrb[18].mxu0 }
 0x70d   : > { %v2614_v19 = vpop.f32.mrb[19].mxu0  ;;  %v1324_v20 = vsel %vm1004_vm7, %v1316_v16, -inf }
 0x70e   : > { %1325 = vmax.xlane.f32.xlu0 %v1324_v20 }
 0x717   : > { %1345 = vrot.lane.b32.xlu1 %v3089_v0, %s2843_s1 }
 0x71b   : > { %1443 = vrot.lane.b32.xlu1 %v3089_v0, %s2844_s18 }
 0x724   : > { %1393 = vrot.lane.b32.xlu0 %v3092_v3, %s2843_s1  ;;  %s3384_s1 = sld [smem:[#allocation4_spill]] }
 0x728   : > { %1441 = vrot.lane.b32.xlu0 %v3089_v0, %s2845_s19 }
 0x793   : > { %v1323_v21 = vpop.xlane.xlu1 %1322 }
 0x794   : > { %v1327_v22 = vsub.f32 %v1266_v6, %v1323_v21 }
 0x796   : > { %v1329_v23 = vmul.f32 1.442695, %v1327_v22 }
 0x797   : > { %v1346_v25 = vpop.permute.xlu1 %1345 }
 0x798   : > { %2789 = vpow2.f32 %v1329_v23  ;;  %v1351_v26 = vsel %vm1129_vm8, %v1346_v25, 0 }
 0x799   : > { %2616 = vmatpush3.bf16.msra.mxu1 %v1351_v26 }
 0x79a   : > { %2627 = vmatprep.subr.bf16.mxu1 %v2837_v54 }
 0x79b   : > { %v1326_v27 = vpop.xlane.xlu0 %1325  ;;  %v1444_v36 = vpop.permute.xlu1 %1443 }
 0x79c   : > { %v1328_v28 = vsub.f32 %v1316_v16, %v1326_v27  ;;  %v1449_v42 = vsel %vm1004_vm7, %v1444_v36, 0 }
 0x79e   : > { %v1331_v29 = vmul.f32 1.442695, %v1328_v28 }
 0x79f   : > { %v1394_v30 = vpop.permute.xlu0 %1393 }
 0x7a0   : > { %2791 = vpow2.f32 %v1331_v29  ;;  %v1399_v31 = vsel %vm1129_vm8, %v1394_v30, 0 }
 0x7a1   : > { %2622 = vmatpush3.bf16.msra.mxu0 %v1399_v31 }
 0x7a2   : > { %v2790_v32 = vpop.eup %2789  ;;  %2633 = vmatprep.subr.bf16.mxu0 %v2837_v54 }
 0x7a3   : > { %v1333_v33 = vsel %vm1004_vm7, %v2790_v32, 0.0  ;;  %v1442_v47 = vpop.permute.xlu0 %1441 }
 0x7a4   : > { %1334 = vadd.xlane.f32.xlu1 %v1333_v33 }
 0x7aa   : > { %v2792_v34 = vpop.eup %2791 }
 0x7ab   : > { %v1336_v35 = vsel %vm1004_vm7, %v2792_v34, 0.0 }
 0x7ac   : > { %1337 = vadd.xlane.f32.xlu1 %v1336_v35 }
 0x7bd   : > { %1493 = vrot.lane.b32.xlu1 %v3092_v3, %s2844_s18  ;;  %s2852_s18 = smov 24  }
 0x7c1   : > { %1491 = vrot.lane.b32.xlu1 %v3092_v3, %s2845_s19 }
 0x831   : > { %v1335_v37 = vpop.xlane.xlu1 %1334 }
 0x832   : > { %2793 = vrcp.f32 %v1335_v37 }
 0x839   : > { %v1338_v38 = vpop.xlane.xlu1 %1337 }
 0x83a   : > { %2795 = vrcp.f32 %v1338_v38 }
 0x83c   : > { %v2794_v39 = vpop.eup %2793 }
 0x83d   : > { %v1341_v40 = vmul.f32 %v2794_v39, %v2790_v32  ;;  %v1494_v45 = vpop.permute.xlu1 %1493 }
 0x83e   : > { %v1499_v48 = vsel %vm1004_vm7, %v1494_v45, 0 }
 0x83f   : > { %v1343_v41 = vpack.c.bf16 %v1341_v40, %v1341_v40 }
 0x841   : > { %2618 = vmatmul.mubr.msk.bf16.vlgmr.msra.gmra.mrb[8].mxu1 %vm1004_vm7, %v1343_v41  ;;  %v1492_v49 = vpop.permute.xlu1 %1491 }
 0x842   : > { %2628 = vmatpush3.bf16.xpose.msra.mxu1 %v1449_v42  ;;  %2629 = vmatprep.mubr.msk.bf16.mxu1 %vm2838_vm5, %v2837_v54 }
 0x843   : > { %2639 = vmatprep.subr.bf16.mxu1 %v2837_v54 }
 0x844   : > { %v2796_v43 = vpop.eup %2795 }
 0x845   : > { %v1342_v44 = vmul.f32 %v2796_v43, %v2792_v34 }
 0x847   : > { %v1344_v46 = vpack.c.bf16 %v1342_v44, %v1342_v44 }
 0x849   : > { %2624 = vmatmul.mubr.msk.bf16.vlgmr.msra.gmra.mrb[20].mxu0 %vm1004_vm7, %v1344_v46  ;;  %2630 = vmatmul.mubr.msk.bf16.vlgmr.msra.gmra.mrb[12].mxu1 %vm1004_vm7, %v1442_v47 }
 0x84a   : > { %2634 = vmatpush3.bf16.xpose.msra.mxu0 %v1499_v48  ;;  %2635 = vmatprep.mubr.msk.bf16.mxu0 %vm2838_vm5, %v2837_v54 }
 0x84b   : > { %2645 = vmatprep.subr.bf16.mxu0 %v2837_v54  ;;  %2641 = vmatprep.mubr.msk.bf16.mxu1 %vm2838_vm5, %v2837_v54 }
 0x851   : > { %2636 = vmatmul.mubr.msk.bf16.vlgmr.msra.gmra.mrb[24].mxu0 %vm1004_vm7, %v1492_v49 }
 0x852   : > { %2647 = vmatprep.mubr.msk.bf16.mxu0 %vm2838_vm5, %v2837_v54 }
 0x914   : > { %v3185_v50 = vpop.f32.mrb[8].mxu1 }
 0x915   : > { %v2619_v51 = vpop.f32.mrb[9].mxu1 }
 0x916   : > { %v1390_v52 = vpop.f32.mrb[10].mxu1 }
 0x917   : > { %v2620_v53 = vpop.f32.mrb[11].mxu1 }
 0x91c   : > { %v3187_v55 = vpop.f32.mrb[20].mxu0  ;;  %v1485_v58 = vpop.f32.mrb[12].mxu1 }
 0x91d   : > { %v2752_v59 = vpack.i.bf16 %v3187_v55, %v3185_v50  ;;  %v1486_v60 = vadd.f32 %v1485_v58, %v3113_v15  ;;  %v2625_v61 = vpop.f32.mrb[21].mxu0  ;;  %v2631_v63 = vpop.f32.mrb[13].mxu1 }
 0x91e   : > { %v1438_v1 = vpop.f32.mrb[22].mxu0  ;;  %v1488_v2 = vpop.f32.mrb[14].mxu1 }
 0x91f   : > { %v2626_v5 = vpop.f32.mrb[23].mxu0  ;;  %v2632_v6 = vpop.f32.mrb[15].mxu1  ;;  %v1541_v7 = vsel %vm1004_vm7, %v1486_v60, -inf }
 0x920   : > { %1542 = vmax.xlane.f32.xlu0 %v1541_v7 }
 0x924   : > { %v1535_v8 = vpop.f32.mrb[24].mxu0 }
 0x925   : > { %v1536_v9 = vadd.f32 %v1535_v8, %v3117_v24  ;;  %v2637_v10 = vpop.f32.mrb[25].mxu0 }
 0x926   : > { %v1538_v11 = vpop.f32.mrb[26].mxu0 }
 0x927   : > { %v2638_v12 = vpop.f32.mrb[27].mxu0  ;;  %v1544_v13 = vsel %vm1004_vm7, %v1536_v9, -inf }
 0x928   : > { %1545 = vmax.xlane.f32.xlu1 %v1544_v13 }
 0x939   : > { %1565 = vrot.lane.b32.xlu1 %v3089_v0, %s2846_s30 }
 0x93d   : > { %1663 = vrot.lane.b32.xlu1 %v3089_v0, %s2847_s2 }
 0x941   : > { %1713 = vrot.lane.b32.xlu1 %v3092_v3, %s2847_s2  ;;  %s3385_s2 = scalar_lea.vmem %s3350_s9, %s2960_s29 }
 0x945   : > { %1711 = vrot.lane.b32.xlu1 %v3092_v3, %s2848_s23 }
 0x9ad   : > { %v1543_v14 = vpop.xlane.xlu0 %1542 }
 0x9ae   : > { %v1547_v16 = vsub.f32 %v1486_v60, %v1543_v14 }
 0x9b0   : > { %v1549_v17 = vmul.f32 1.442695, %v1547_v16 }
 0x9b2   : > { %2797 = vpow2.f32 %v1549_v17 }
 0x9b5   : > { %v1546_v18 = vpop.xlane.xlu1 %1545 }
 0x9b6   : > { %v1548_v19 = vsub.f32 %v1536_v9, %v1546_v18 }
 0x9b8   : > { %v1551_v20 = vmul.f32 1.442695, %v1548_v19 }
 0x9b9   : > { %v1566_v21 = vpop.permute.xlu1 %1565 }
 0x9ba   : > { %2799 = vpow2.f32 %v1551_v20  ;;  %v1571_v22 = vsel %vm1129_vm8, %v1566_v21, 0 }
 0x9bb   : > { %2640 = vmatpush3.bf16.msra.mxu1 %v1571_v22 }
 0x9bc   : > { %v2798_v23 = vpop.eup %2797  ;;  %2651 = vmatprep.subr.bf16.mxu1 %v2837_v54 }
 0x9bd   : > { %v1553_v25 = vsel %vm1004_vm7, %v2798_v23, 0.0  ;;  %v1664_v33 = vpop.permute.xlu1 %1663 }
 0x9be   : > { %1554 = vadd.xlane.f32.xlu0 %v1553_v25  ;;  %v1669_v36 = vsel %vm1004_vm7, %v1664_v33, 0 }
 0x9c1   : > { %v1714_v39 = vpop.permute.xlu1 %1713 }
 0x9c2   : > { %v1719_v42 = vsel %vm1004_vm7, %v1714_v39, 0 }
 0x9c4   : > { %v2800_v26 = vpop.eup %2799 }
 0x9c5   : > { %v1556_v27 = vsel %vm1004_vm7, %v2800_v26, 0.0  ;;  %v1712_v43 = vpop.permute.xlu1 %1711 }
 0x9c6   : > { %1557 = vadd.xlane.f32.xlu0 %v1556_v27 }
 0x9dc   : > { %1613 = vrot.lane.b32.xlu0 %v3092_v3, %s2846_s30 }
 0x9e0   : > { %1661 = vrot.lane.b32.xlu0 %v3089_v0, %s2848_s23 }
 0xa4b   : > { %v1555_v28 = vpop.xlane.xlu0 %1554 }
 0xa4c   : > { %2801 = vrcp.f32 %v1555_v28  ;;  %v2769_v28 = vld [vmem:[%s3384_s1] sm:$0xff]  }
 0xa53   : > { %v1558_v29 = vpop.xlane.xlu0 %1557 }
 0xa54   : > { %2803 = vrcp.f32 %v1558_v29  ;;  %v2770_v29 = vld [vmem:[%s3384_s1 + $0x8] sm:$0xff]   ;;  %s3387_s1 = scalar_lea.vmem %s3352_s11, %s2960_s29 }
 0xa56   : > { %v2802_v30 = vpop.eup %2801 }
 0xa57   : > { %v1561_v31 = vmul.f32 %v2802_v30, %v2798_v23  ;;  %v1614_v32 = vpop.permute.xlu0 %1613 }
 0xa58   : > { %v1619_v34 = vsel %vm1129_vm8, %v1614_v32, 0 }
 0xa59   : > { %2646 = vmatpush3.bf16.msra.mxu0 %v1619_v34  ;;  %v1563_v35 = vpack.c.bf16 %v1561_v31, %v1561_v31 }
 0xa5a   : > { %2657 = vmatprep.subr.bf16.mxu0 %v2837_v54 }
 0xa5b   : > { %2642 = vmatmul.mubr.msk.bf16.vlgmr.msra.gmra.mrb[16].mxu1 %vm1004_vm7, %v1563_v35  ;;  %v1662_v41 = vpop.permute.xlu0 %1661 }
 0xa5c   : > { %2652 = vmatpush3.bf16.xpose.msra.mxu1 %v1669_v36  ;;  %2653 = vmatprep.mubr.msk.bf16.mxu1 %vm2838_vm5, %v2837_v54 }
 0xa5d   : > { %2663 = vmatprep.subr.bf16.mxu1 %v2837_v54 }
 0xa5e   : > { %v2804_v37 = vpop.eup %2803 }
 0xa5f   : > { %v1562_v38 = vmul.f32 %v2804_v37, %v2800_v26 }
 0xa61   : > { %v1564_v40 = vpack.c.bf16 %v1562_v38, %v1562_v38 }
 0xa63   : > { %2648 = vmatmul.mubr.msk.bf16.vlgmr.msra.gmra.mrb[28].mxu0 %vm1004_vm7, %v1564_v40  ;;  %2654 = vmatmul.mubr.msk.bf16.vlgmr.msra.gmra.mrb[20].mxu1 %vm1004_vm7, %v1662_v41 }
 0xa64   : > { %2658 = vmatpush3.bf16.xpose.msra.mxu0 %v1719_v42  ;;  %2659 = vmatprep.mubr.msk.bf16.mxu0 %vm2838_vm5, %v2837_v54 }
 0xa65   : > { %2669 = vmatprep.subr.bf16.mxu0 %v2837_v54  ;;  %2665 = vmatprep.mubr.msk.bf16.mxu1 %vm2838_vm5, %v2837_v54 }
 0xa6b   : > { %2660 = vmatmul.mubr.msk.bf16.vlgmr.msra.gmra.mrb[32].mxu0 %vm1004_vm7, %v1712_v43 }
 0xa6c   : > { %2671 = vmatprep.mubr.msk.bf16.mxu0 %vm2838_vm5, %v2837_v54 }
 0xb2e   : > { %v1607_v44 = vpop.f32.mrb[16].mxu1 }
 0xb2f   : > { %v2643_v45 = vpop.f32.mrb[17].mxu1 }
 0xb30   : > { %v1610_v46 = vpop.f32.mrb[18].mxu1 }
 0xb31   : > { %v2644_v47 = vpop.f32.mrb[19].mxu1 }
 0xb36   : > { %v1655_v48 = vpop.f32.mrb[28].mxu0  ;;  %v1705_v49 = vpop.f32.mrb[20].mxu1 }
 0xb37   : > { %v2757_v51 = vpack.i.bf16 %v1655_v48, %v1607_v44  ;;  %v1706_v52 = vadd.f32 %v1705_v49, %v3113_v15  ;;  %v2649_v53 = vpop.f32.mrb[29].mxu0  ;;  %v2655_v58 = vpop.f32.mrb[21].mxu1 }
 0xb38   : > { %v1658_v60 = vpop.f32.mrb[30].mxu0  ;;  %v1708_v61 = vpop.f32.mrb[22].mxu1 }
 0xb39   : > { %v2650_v63 = vpop.f32.mrb[31].mxu0  ;;  %v2656_v1 = vpop.f32.mrb[23].mxu1  ;;  %v1761_v2 = vsel %vm1004_vm7, %v1706_v52, -inf }
 0xb3a   : > { %1762 = vmax.xlane.f32.xlu0 %v1761_v2 }
 0xb3e   : > { %v1755_v5 = vpop.f32.mrb[32].mxu0 }
 0xb3f   : > { %v1756_v6 = vadd.f32 %v1755_v5, %v3117_v24  ;;  %v2661_v7 = vpop.f32.mrb[33].mxu0 }
 0xb40   : > { %v1758_v8 = vpop.f32.mrb[34].mxu0 }
 0xb41   : > { %v2662_v9 = vpop.f32.mrb[35].mxu0  ;;  %v1764_v10 = vsel %vm1004_vm7, %v1756_v6, -inf }
 0xb42   : > { %1765 = vmax.xlane.f32.xlu1 %v1764_v10 }
 0xb53   : > { %1785 = vrot.lane.b32.xlu1 %v3089_v0, %s2849_s24 }
 0xb57   : > { %2753 = vrot.lane.b32.xlu1 %v2752_v59, %s2850_s22  ;;  %s3386_s22 = scalar_lea.vmem %s3351_s10, %s2960_s29 }
 0xb5b   : > { %2758 = vrot.lane.b32.xlu1 %v2757_v51, %s2851_s26 }
 0xbc7   : > { %v1763_v15 = vpop.xlane.xlu0 %1762 }
 0xbc8   : > { %v1767_v11 = vsub.f32 %v1706_v52, %v1763_v15 }
 0xbca   : > { %v1769_v12 = vmul.f32 1.442695, %v1767_v11 }
 0xbcc   : > { %2805 = vpow2.f32 %v1769_v12 }
 0xbcf   : > { %v1766_v24 = vpop.xlane.xlu1 %1765 }
 0xbd0   : > { %v1768_v13 = vsub.f32 %v1756_v6, %v1766_v24 }
 0xbd2   : > { %v1771_v14 = vmul.f32 1.442695, %v1768_v13 }
 0xbd3   : > { %v1786_v16 = vpop.permute.xlu1 %1785 }
 0xbd4   : > { %2807 = vpow2.f32 %v1771_v14  ;;  %v1791_v17 = vsel %vm1129_vm8, %v1786_v16, 0 }
 0xbd5   : > { %2664 = vmatpush3.bf16.msra.mxu1 %v1791_v17 }
 0xbd6   : > { %v2806_v0 = vpop.eup %2805  ;;  %2675 = vmatprep.subr.bf16.mxu1 %v2837_v54 }
 0xbd7   : > { %v1773_v50 = vsel %vm1004_vm7, %v2806_v0, 0.0  ;;  %v2754_v39 = vpop.permute.xlu1 %2753 }
 0xbd8   : > { %1774 = vadd.xlane.f32.xlu0 %v1773_v50  ;;  %v2756_v41 = vunpack.i.h.bf16 %v2754_v39  ;;  %v2755_v42 = vunpack.i.l.bf16 %v2754_v39  ;;  %v2780_v39 = vld [vmem:[%s3002_s27 + $0x38] sm:$0xff]  }
 0xbda   : > { %v1906_v46 = vsel %vm1004_vm7, %v3151_v4, %v2756_v41  ;;  %v1905_v47 = vsel %vm1004_vm7, %v3149_v62, %v2755_v42  ;;  %v2464_v4 = vld [vmem:[%s3385_s2] ss:$0 sm:$0xff] }
 0xbdb   : > { %v2759_v40 = vpop.permute.xlu1 %2758 }
 0xbdc   : > { %v2761_v43 = vunpack.i.h.bf16 %v2759_v40  ;;  %v2760_v44 = vunpack.i.l.bf16 %v2759_v40  ;;  %v2470_v40 = vld [vmem:[%s718_s8] ss:$0 sm:$0xff] }
 0xbde   : > { %v2808_v55 = vpop.eup %2807  ;;  %v1908_v51 = vsel %vm1907_vm9, %v1905_v47, %v2760_v44  ;;  %v1909_v52 = vsel %vm1907_vm9, %v1906_v46, %v2761_v43 }
 0xbdf   : > { %v1776_v59 = vsel %vm1004_vm7, %v2808_v55, 0.0 }
 0xbe0   : > { %1777 = vadd.xlane.f32.xlu0 %v1776_v59 }
 0xbf6   : > { %1833 = vrot.lane.b32.xlu0 %v3092_v3, %s2849_s24 }
 0xc65   : > { %v1775_v18 = vpop.xlane.xlu0 %1774 }
 0xc66   : > { %2809 = vrcp.f32 %v1775_v18 }
 0xc6d   : > { %v1778_v19 = vpop.xlane.xlu0 %1777 }
 0xc6e   : > { %2811 = vrcp.f32 %v1778_v19 }
 0xc70   : > { %v2810_v20 = vpop.eup %2809 }
 0xc71   : > { %v1781_v21 = vmul.f32 %v2810_v20, %v2806_v0  ;;  %v1834_v22 = vpop.permute.xlu0 %1833  ;;  %v2772_v0 = vld [vmem:[%s2992_s6 + $0x8] sm:$0xff]  }
 0xc72   : > { %v1839_v23 = vsel %vm1129_vm8, %v1834_v22, 0  ;;  %v2468_v22 = vld [vmem:[%s3386_s22] ss:$0 sm:$0xff]  ;;  %s3388_s22 = sld [smem:[#allocation12_spill]] (!%p2485_p5) }
 0xc73   : > { %2670 = vmatpush3.bf16.msra.mxu0 %v1839_v23  ;;  %v1783_v25 = vpack.c.bf16 %v1781_v21, %v1781_v21 }
 0xc74   : > { %2683 = vmatprep.subr.bf16.mxu0 %v2837_v54 }
 0xc75   : > { %2666 = vmatmul.mubr.msk.bf16.vlgmr.msra.gmra.mrb[24].mxu1 %vm1004_vm7, %v1783_v25 }
 0xc76   : > { %2679 = vmatprep.mubr.msk.bf16.mxu1 %vm2838_vm5, %v2837_v54  ;;  %2676 = vmatpush3.bf16.msra.mxu1 %v2769_v28 }
 0xc77   : > { %2677 = vmatprep.subr.bf16.mxu1 %v2837_v54 }
 0xc78   : > { %v2812_v3 = vpop.eup %2811 }
 0xc79   : > { %v1782_v26 = vmul.f32 %v2812_v3, %v2808_v55 }
 0xc7a   : > { %2678 = vmatpush3.bf16.msra.mxu1 %v2770_v29 }
 0xc7b   : > { %v1784_v27 = vpack.c.bf16 %v1782_v26, %v1782_v26  ;;  %2691 = vmatprep.subr.bf16.mxu1 %v2837_v54 }
 0xc7d   : > { %2672 = vmatmul.mubr.msk.bf16.vlgmr.msra.gmra.mrb[36].mxu0 %vm1004_vm7, %v1784_v27  ;;  %v2469_v27 = vld [vmem:[%s3387_s1] ss:$0 sm:$0xff] }
 0xc7e   : > { %2687 = vmatprep.mubr.msk.bf16.mxu0 %vm2838_vm5, %v2837_v54 }
 0xd48   : > { %v1827_v30 = vpop.f32.mrb[24].mxu1 }
 0xd49   : > { %v2667_v31 = vpop.f32.mrb[25].mxu1 }
 0xd4a   : > { %v1830_v32 = vpop.f32.mrb[26].mxu1 }
 0xd4b   : > { %v2668_v33 = vpop.f32.mrb[27].mxu1  ;;  %v2773_v32 = vld [vmem:[%s3002_s27] sm:$0xff]  }
 0xd4c   : > { %v2774_v33 = vld [vmem:[%s3002_s27 + $0x8] sm:$0xff]  }
 0xd50   : > { %v1875_v34 = vpop.f32.mrb[36].mxu0 }
 0xd51   : > { %v2762_v35 = vpack.i.bf16 %v1875_v34, %v1827_v30  ;;  %v2673_v36 = vpop.f32.mrb[37].mxu0  ;;  %v2775_v34 = vld [vmem:[%s3002_s27 + $0x10] sm:$0xff]  }
 0xd52   : > { %v1878_v37 = vpop.f32.mrb[38].mxu0  ;;  %v2777_v36 = vld [vmem:[%s3002_s27 + $0x20] sm:$0xff]  }
 0xd53   : > { %2763 = vrot.lane.b32.xlu0 %v2762_v35, %s2852_s18  ;;  %v2674_v38 = vpop.f32.mrb[39].mxu0  ;;  %v2776_v35 = vld [vmem:[%s3002_s27 + $0x18] sm:$0xff]   ;;  %v2778_v37 = vld [vmem:[%s3002_s27 + $0x28] sm:$0xff]  }
 0xd54   : > { %v2779_v38 = vld [vmem:[%s3002_s27 + $0x30] sm:$0xff]  }
 0xdc5   : > { %v2764_v45 = vpop.permute.xlu0 %2763 }
 0xdc6   : > { %v2766_v48 = vunpack.i.h.bf16 %v2764_v45  ;;  %v2765_v49 = vunpack.i.l.bf16 %v2764_v45 }
 0xdc8   : > { %v1912_v53 = vsel %vm1910_vm10, %v1909_v52, %v2766_v48  ;;  %v1911_v58 = vsel %vm1910_vm10, %v1908_v51, %v2765_v49 }
 0xdc9   : > { %v1913_v60 = vpack.c.bf16 %v1912_v53, %v1911_v58 }
 0xdcb   : > { %2680 = vmatmul.mubr.msk.bf16.vlgmr.msra.gmra.mrb[28].mxu1 %vm954_vm6, %v1913_v60 }
 0xdcc   : > { %2707 = vmatprep.mubr.msk.bf16.mxu1 %vm2838_vm5, %v2837_v54  ;;  %2692 = vmatpush3.bf16.msra.mxu1 %v2773_v32 }
 0xdcd   : > { %2693 = vmatprep.subr.bf16.mxu1 %v2837_v54 }
 0xdd0   : > { %2694 = vmatpush3.bf16.msra.mxu1 %v2774_v33  ;;  %v2484_v33 = vld [vmem:[%s732_s4] ss:$0 sm:$0xff] }
 0xdd1   : > { %2695 = vmatprep.subr.bf16.mxu1 %v2837_v54 }
 0xdd4   : > { %2696 = vmatpush3.bf16.msra.mxu1 %v2775_v34 }
 0xdd5   : > { %2697 = vmatprep.subr.bf16.mxu1 %v2837_v54 }
 0xdd8   : > { %2698 = vmatpush3.bf16.msra.mxu1 %v2776_v35 }
 0xdd9   : > { %2699 = vmatprep.subr.bf16.mxu1 %v2837_v54 }
 0xddc   : > { %2700 = vmatpush3.bf16.msra.mxu1 %v2777_v36 }
 0xddd   : > { %2701 = vmatprep.subr.bf16.mxu1 %v2837_v54 }
 0xde0   : > { %2702 = vmatpush3.bf16.msra.mxu1 %v2778_v37 }
 0xde1   : > { %2703 = vmatprep.subr.bf16.mxu1 %v2837_v54 }
 0xde4   : > { %2704 = vmatpush3.bf16.msra.mxu1 %v2779_v38 }
 0xde5   : > { %2705 = vmatprep.subr.bf16.mxu1 %v2837_v54 }
 0xde8   : > { %2706 = vmatpush3.bf16.msra.mxu1 %v2780_v39 }
 0xe9e   : > { %v1974_v61 = vpop.f32.mrb[28].mxu1 }
 0xe9f   : > { %v1975_v63 = vadd.f32 %v2464_v4, %v1974_v61  ;;  %v2681_v62 = vpop.f32.mrb[29].mxu1 }
 0xea0   : > { %v1977_v1 = vpop.f32.mrb[30].mxu1 }
 0xea1   : > { %v1978_v2 = vadd.f32 %v2464_v4, %v1977_v1  ;;  %v2682_v5 = vpop.f32.mrb[31].mxu1  ;;  %v1981_v6 = vadd.f32 %v1975_v63, %v3071_v56 }
 0xea3   : > { %v1985_v7 = vsel %vm954_vm6, %v1981_v6, 0.0  ;;  %v1982_v8 = vadd.f32 %v1978_v2, %v3073_v57  ;;  %v2771_v57 = vld [vmem:[%s2992_s6] sm:$0xff]  }
 0xea4   : > { %1986 = vadd.xlane.f32.xlu1 %v1985_v7  ;;  %2684 = vmatpush3.bf16.msra.mxu0 %v2771_v57 }
 0xea5   : > { %v1988_v9 = vsel %vm954_vm6, %v1982_v8, 0.0  ;;  %2685 = vmatprep.subr.bf16.mxu0 %v2837_v54 }
 0xea6   : > { %1989 = vadd.xlane.f32.xlu0 %v1988_v9  ;;  %v2474_v9 = vld [vmem:[%s726_s0] ss:$0 sm:$0xff] }
 0xea8   : > { %2686 = vmatpush3.bf16.msra.mxu0 %v2772_v0 }
 0xf31   : > { %v1987_v10 = vpop.xlane.xlu1 %1986 }
 0xf32   : > { %v1992_v15 = vmul.f32 0.03125, %v1987_v10 }
 0xf33   : > { %v1990_v11 = vpop.xlane.xlu0 %1989 }
 0xf34   : > { %v1994_v12 = vsub.f32 %v1981_v6, %v1992_v15  ;;  %v1993_v24 = vmul.f32 0.03125, %v1990_v11 }
 0xf36   : > { %v1995_v13 = vsub.f32 %v1982_v8, %v1993_v24  ;;  %v1996_v14 = vmul.f32 %v1994_v12, %v1994_v12 }
 0xf38   : > { %v1998_v16 = vsel %vm954_vm6, %v1996_v14, 0.0  ;;  %v1997_v56 = vmul.f32 %v1995_v13, %v1995_v13 }
 0xf39   : > { %1999 = vadd.xlane.f32.xlu0 %v1998_v16 }
 0xf3a   : > { %v2001_v17 = vsel %vm954_vm6, %v1997_v56, 0.0 }
 0xf3b   : > { %2002 = vadd.xlane.f32.xlu1 %v2001_v17 }
 0xfc6   : > { %v2000_v50 = vpop.xlane.xlu0 %1999 }
 0xfc7   : > { %v2004_v55 = vmul.f32 0.03125, %v2000_v50 }
 0xfc8   : > { %v2003_v59 = vpop.xlane.xlu1 %2002 }
 0xfc9   : > { %v2006_v18 = vadd.f32 1e-12, %v2004_v55  ;;  %v2005_v19 = vmul.f32 0.03125, %v2003_v59 }
 0xfcb   : > { %2813 = vrsqrt.f32 %v2006_v18  ;;  %v2007_v20 = vadd.f32 1e-12, %v2005_v19 }
 0xfcd   : > { %2815 = vrsqrt.f32 %v2007_v20 }
 0xfd5   : > { %v2814_v21 = vpop.eup %2813 }
 0xfd6   : > { %v2010_v23 = vmul.f32 %v2814_v21, %v1994_v12 }
 0xfd7   : > { %v2816_v25 = vpop.eup %2815 }
 0xfd8   : > { %v2018_v3 = vmul.f32 %v2468_v22, %v2010_v23  ;;  %v2011_v26 = vmul.f32 %v2816_v25, %v1995_v13 }
 0xfda   : > { %v2019_v28 = vmul.f32 %v2468_v22, %v2011_v26  ;;  %v3279_v29 = vadd.f32 %v2469_v27, %v2018_v3 }
 0xfdc   : > { %v3281_v30 = vadd.f32 %v2469_v27, %v2019_v28 }
 0xfde   : > { %v2028_v31 = vpack.c.bf16 %v3281_v30, %v3279_v29 }
 0xfe0   : > { %2688 = vmatmul.mubr.msk.bf16.vlgmr.msra.gmra.mrb[40].mxu0 %vm954_vm6, %v2028_v31 }
0x10b3   : > { %v2089_v41 = vpop.f32.mrb[40].mxu0 }
0x10b4   : > { %v2090_v42 = vadd.f32 %v2470_v40, %v2089_v41  ;;  %v2689_v43 = vpop.f32.mrb[41].mxu0 }
0x10b5   : > { %v2092_v44 = vpop.f32.mrb[42].mxu0 }
0x10b6   : > { %v2096_v45 = vmul.f32 %v2090_v42, %v2090_v42  ;;  %v2093_v46 = vadd.f32 %v2470_v40, %v2092_v44  ;;  %v2690_v47 = vpop.f32.mrb[43].mxu0 }
0x10b8   : > { %v2098_v48 = vmul.f32 %v2096_v45, %v2090_v42  ;;  %v2097_v49 = vmul.f32 %v2093_v46, %v2093_v46 }
0x10ba   : > { %v2100_v51 = vmul.f32 0.044715, %v2098_v48  ;;  %v2099_v52 = vmul.f32 %v2097_v49, %v2093_v46 }
0x10bc   : > { %v2102_v53 = vadd.f32 %v2100_v51, %v2090_v42  ;;  %v2101_v54 = vmul.f32 0.044715, %v2099_v52 }
0x10be   : > { %v2104_v58 = vmul.f32 0.7978846, %v2102_v53  ;;  %v2103_v60 = vadd.f32 %v2101_v54, %v2093_v46 }
0x10c0   : > { %2817 = vtanh.f32 %v2104_v58  ;;  %v2105_v4 = vmul.f32 0.7978846, %v2103_v60 }
0x10c2   : > { %2819 = vtanh.f32 %v2105_v4 }
0x10ca   : > { %v2818_v61 = vpop.eup %2817 }
0x10cb   : > { %v2108_v63 = vadd.f32 1.0, %v2818_v61 }
0x10cc   : > { %v2820_v62 = vpop.eup %2819 }
0x10cd   : > { %v2110_v1 = vmul.f32 0.5, %v2108_v63  ;;  %v2109_v2 = vadd.f32 1.0, %v2820_v62 }
0x10cf   : > { %v2111_v5 = vmul.f32 0.5, %v2109_v2  ;;  %v2112_v6 = vmul.f32 %v2110_v1, %v2090_v42 }
0x10d1   : > { %v2113_v7 = vmul.f32 %v2111_v5, %v2093_v46 }
0x10d3   : > { %v2114_v8 = vpack.c.bf16 %v2113_v7, %v2112_v6 }
0x10d5   : > { %2708 = vmatmul.mubr.bf16.vlgmr.msra.gmra.mrb[32].mxu1 %v2114_v8 }
0x11a8   : > { %v2220_v10 = vpop.f32.mrb[32].mxu1 }
0x11a9   : > { %v2221_v15 = vadd.f32 %v2474_v9, %v2220_v10  ;;  %v2709_v11 = vpop.f32.mrb[33].mxu1 }
0x11aa   : > { %v2223_v12 = vpop.f32.mrb[34].mxu1 }
0x11ab   : > { %v2224_v24 = vadd.f32 %v2474_v9, %v2223_v12  ;;  %v2710_v13 = vpop.f32.mrb[35].mxu1  ;;  %v2227_v14 = vadd.f32 %v2221_v15, %v3279_v29 }
0x11ad   : > { %v2231_v16 = vsel %vm954_vm6, %v2227_v14, 0.0  ;;  %v2228_v56 = vadd.f32 %v2224_v24, %v3281_v30  ;;  %v2483_v30 = vld [vmem:[%s729_s20] ss:$0 sm:$0xff] }
0x11ae   : > { %2232 = vadd.xlane.f32.xlu0 %v2231_v16 }
0x11af   : > { %v2234_v17 = vsel %vm954_vm6, %v2228_v56, 0.0 }
0x11b0   : > { %2235 = vadd.xlane.f32.xlu1 %v2234_v17 }
0x123b   : > { %v2233_v57 = vpop.xlane.xlu0 %2232 }
0x123c   : > { %v2237_v0 = vmul.f32 0.03125, %v2233_v57 }
0x123d   : > { %v2236_v50 = vpop.xlane.xlu1 %2235 }
0x123e   : > { %v2239_v55 = vsub.f32 %v2227_v14, %v2237_v0  ;;  %v2238_v59 = vmul.f32 0.03125, %v2236_v50 }
0x1240   : > { %v2240_v18 = vsub.f32 %v2228_v56, %v2238_v59  ;;  %v2241_v19 = vmul.f32 %v2239_v55, %v2239_v55 }
0x1242   : > { %v2243_v20 = vsel %vm954_vm6, %v2241_v19, 0.0  ;;  %v2242_v21 = vmul.f32 %v2240_v18, %v2240_v18 }
0x1243   : > { %2244 = vadd.xlane.f32.xlu0 %v2243_v20 }
0x1244   : > { %v2246_v22 = vsel %vm954_vm6, %v2242_v21, 0.0 }
0x1245   : > { %2247 = vadd.xlane.f32.xlu1 %v2246_v22 }
0x12d0   : > { %v2245_v23 = vpop.xlane.xlu0 %2244 }
0x12d1   : > { %v2249_v25 = vmul.f32 0.03125, %v2245_v23 }
0x12d2   : > { %v2248_v3 = vpop.xlane.xlu1 %2247 }
0x12d3   : > { %v2251_v26 = vadd.f32 1e-12, %v2249_v25  ;;  %v2250_v27 = vmul.f32 0.03125, %v2248_v3 }
0x12d5   : > { %2821 = vrsqrt.f32 %v2251_v26  ;;  %v2252_v28 = vadd.f32 1e-12, %v2250_v27 }
0x12d7   : > { %2823 = vrsqrt.f32 %v2252_v28 }
0x12df   : > { %v2822_v29 = vpop.eup %2821 }
0x12e0   : > { %v2255_v31 = vmul.f32 %v2822_v29, %v2239_v55 }
0x12e1   : > { %v2824_v32 = vpop.eup %2823 }
0x12e2   : > { %v2263_v34 = vmul.f32 %v2483_v30, %v2255_v31  ;;  %v2256_v35 = vmul.f32 %v2824_v32, %v2240_v18  ;;  %2278 = sbr.rel (%p2485_p5) target bundleno = 4841 (0x12e9), region = 100 }
0x12e4   : > { %v2271_v36 = vadd.f32 %v2484_v33, %v2263_v34  ;;  %v2264_v37 = vmul.f32 %v2483_v30, %v2256_v35 }
0x12e6   : > { %2273 = vst.msk [vmem:[#allocation2] sm:$0xff] %vm954_vm6, %v2271_v36  ;;  %v2272_v38 = vadd.f32 %v2484_v33, %v2264_v37  ;;  %2279 = vst.msk [vmem:[%s3388_s22] sm:$0xff] (!%p2485_p5), %vm954_vm6, %v2271_v36 }
0x12e8   : > { %2274 = vst.msk [vmem:[#allocation2 + $0x8] sm:$0xff] %vm954_vm6, %v2272_v38  ;;  %2280 = vst.msk [vmem:[%s3388_s22 + $0x8] sm:$0xff] (!%p2485_p5), %vm954_vm6, %v2272_v38 }
0x12e9 PF: > { %s3389_s6 = sld [smem:[#allocation3_spill]] }
0x12ef   : > { %s28_s27 = sadd.s32 1, %s3389_s6  }
0x12f0   : > { %p25_p6 = scmp.ge.s32.totalorder %s28_s27, 4  }
0x12f2   :  { %27 = sbr.rel (!%p25_p6) target bundleno = 9 (0x9), region = 159 }

</bundles_post_ra>
